<compile_context>
chip_gen: v6e
topology: v6e:2x2x1
jax: 0.10.0
libtpu: 0.0.40
codegen_flags: <defaults>
</compile_context>

<pallas_src>
import jax
import jax.numpy as jnp
from jax.experimental import pallas as pl
from jax.experimental.pallas import tpu as pltpu


def _round_up(x, m):
    return ((x + m - 1) // m) * m


def _stage_dtype(cin):
    # bf16 feeds all three MXU generations natively, but only when Cin keeps
    # the packed sublane layout aligned (16 rows per bf16 vreg).
    return jnp.bfloat16 if cin % 16 == 0 else jnp.float32


def _tap_shifts(dilations, dmax, wp):
    """Flat lane shift of every (branch, ky, kx) tap over the dmax-padded,
    row-major-flattened image."""
    taps = []
    for d in dilations:
        base = dmax - d
        for ky in range(3):
            for kx in range(3):
                taps.append((base + ky * d) * wp + (base + kx * d))
    return taps


def _make_staged_kernel(cin, cin_pad, height, width, wp, lanes, dmax, taps,
                        stage_dtype):
    """im2col-staged form: one big-K MXU matmul per image."""

    def kernel(x_ref, w_ref, b_ref, out_ref, xpad_ref, p_ref):
        # x_ref   : (1, Cin, H*W)            unpadded image
        # w_ref   : (Cout, n_taps*Cin_pad)   fused weights, (branch,ky,kx,cin) cols
        # b_ref   : (Cout, 1) f32            summed biases
        # out_ref : (1, Cout, H*Wp) f32      lane-dense output (junk cols cropped outside)
        # xpad_ref: (Cin_pad, Lp)            zero-padded, flattened image (VMEM scratch)
        # p_ref   : (n_taps*Cin_pad, H*Wp)   im2col staging buffer (VMEM scratch)
        xin = x_ref[0].astype(stage_dtype)                 # (Cin, H*W)

        # In-kernel zero pad: zero the slab, then copy each input row into the
        # interior of its padded row (no padded tensor ever hits HBM).
        xpad_ref[...] = jnp.zeros_like(xpad_ref)
        for hh in range(height):                           # static, unrolled
            base = (hh + dmax) * wp + dmax
            xpad_ref[:cin, base:base + width] = xin[:, hh * width:(hh + 1) * width]

        # im2col: each tap is a contiguous lane shift of the flattened image;
        # Cin_pad rows per tap -> whole-sublane (unmasked) stores.
        for t, s in enumerate(taps):                       # static, unrolled
            p_ref[t * cin_pad:(t + 1) * cin_pad, :] = xpad_ref[:, s:s + lanes]

        # One big-K MXU matmul; f32 accumulation.
        z = jnp.dot(w_ref[...], p_ref[...], preferred_element_type=jnp.float32)
        out_ref[0] = z + b_ref[...]

    return kernel


def _make_accum_kernel(cin, cout, height, width, wp, lanes, dmax, taps,
                       stage_dtype):
    """Per-tap accumulate form: no im2col staging (production / v7x VMEM)."""

    def kernel(x_ref, w_ref, b_ref, out_ref, xpad_ref):
        # w_ref : (n_taps, Cout, Cin_pad) per-tap weights
        xin = x_ref[0].astype(stage_dtype)
        xpad_ref[...] = jnp.zeros_like(xpad_ref)
        for hh in range(height):
            base = (hh + dmax) * wp + dmax
            xpad_ref[:cin, base:base + width] = xin[:, hh * width:(hh + 1) * width]

        out_ref[0] = jnp.broadcast_to(b_ref[...], (cout, lanes))
        for t, s in enumerate(taps):                       # static, unrolled
            out_ref[0] += jnp.dot(w_ref[t], xpad_ref[:, s:s + lanes],
                                  preferred_element_type=jnp.float32)

    return kernel


def classifier_module_forward(x_nchw, params, dilation_series,
                              padding_series=None, *, force_accum=None):
    """Reproduces Classifier_Module.forward: conv0(x) + conv1(x) (early return).

    x_nchw : [N, Cin, H, W] float (pass bf16 to halve the input HBM stream)
    params : list of (weight_hwio [3,3,Cin,Cout], bias [Cout]) per branch
    """
    if len(params) < 2:
        raise ValueError("forward() semantics require >= 2 branches")
    if padding_series is None:
        padding_series = dilation_series
    d1, d2 = int(dilation_series[0]), int(dilation_series[1])
    p1, p2 = int(padding_series[0]), int(padding_series[1])
    if (d1, d2) != (p1, p2):
        # The flat-shift construction assumes 'same'-style padding == dilation
        # for the two used branches (always true for DeepLabV2's ASPP head).
        raise ValueError("padding_series must equal dilation_series for the "
                         "two branches used by the early-return forward")

    N, Cin, H, W = x_nchw.shape
    Cout = params[0][0].shape[-1]
    dmax = max(d1, d2)
    Hp, Wp = H + 2 * dmax, W + 2 * dmax
    L = H * Wp                       # lane length of the padded-column output
    n_taps = 2 * 9
    taps = _tap_shifts((d1, d2), dmax, Wp)
    # Tail so the largest tap shift stays in bounds; lane-multiple for layout.
    Lp = _round_up(Hp * Wp + 2 * dmax, 128)

    stage_dtype = _stage_dtype(Cin)
    sub = 16 if stage_dtype == jnp.bfloat16 else 8
    Cin_pad = _round_up(Cin, sub)    # whole-sublane rows per tap
    use_accum = (Cin >= 128) if force_accum is None else bool(force_accum)

    # Input: unpadded, flattened; dtype left as given (cast happens in-kernel).
    xf = x_nchw.reshape(N, Cin, H * W)

    # Single summed bias (one stream / one VPU add instead of two).
    bsum = (params[0][1] + params[1][1]).astype(jnp.float32).reshape(Cout, 1)

    def pad_cin(w_hwio):             # zero-pad weight Cin axis to Cin_pad
        if Cin_pad == Cin:
            return w_hwio
        return jnp.pad(w_hwio, ((0, 0), (0, 0), (0, Cin_pad - Cin), (0, 0)))

    if use_accum:
        # Per-tap weights [n_taps, Cout, Cin_pad]; tap order (branch, ky, kx).
        def per_tap(w_hwio):         # [3,3,Cin_pad,Cout] -> [9, Cout, Cin_pad]
            return jnp.transpose(w_hwio, (0, 1, 3, 2)).reshape(9, Cout, Cin_pad)
        w_arg = jnp.concatenate([per_tap(pad_cin(params[0][0])),
                                 per_tap(pad_cin(params[1][0]))],
                                axis=0).astype(stage_dtype)
        kernel = _make_accum_kernel(Cin, Cout, H, W, Wp, L, dmax, taps,
                                    stage_dtype)
        w_spec = pl.BlockSpec((n_taps, Cout, Cin_pad), lambda n: (0, 0, 0))
        scratch = [pltpu.VMEM((Cin_pad, Lp), stage_dtype)]
    else:
        # Fused weights [Cout, 18*Cin_pad]; column order (branch, ky, kx, cin).
        def fuse(w_hwio):            # [3,3,Cin_pad,Cout] -> [Cout, 9*Cin_pad]
            return jnp.transpose(w_hwio, (3, 0, 1, 2)).reshape(Cout, 9 * Cin_pad)
        w_arg = jnp.concatenate([fuse(pad_cin(params[0][0])),
                                 fuse(pad_cin(params[1][0]))],
                                axis=1).astype(stage_dtype)
        kernel = _make_staged_kernel(Cin, Cin_pad, H, W, Wp, L, dmax, taps,
                                     stage_dtype)
        w_spec = pl.BlockSpec((Cout, n_taps * Cin_pad), lambda n: (0, 0))
        scratch = [pltpu.VMEM((Cin_pad, Lp), stage_dtype),
                   pltpu.VMEM((n_taps * Cin_pad, L), stage_dtype)]

    # Rough VMEM budget; raise the scoped limit only when defaults get tight.
    # TODO(synk): per-generation tile sizing (v7x 64 MiB, v6e/v5e 128 MiB),
    # spatial row tiling with halos, Buffered(3) input pipelining on v6e.
    sb = jnp.dtype(stage_dtype).itemsize
    est = (2 * Cin * H * W * jnp.dtype(x_nchw.dtype).itemsize  # x block x2
           + 2 * w_arg.size * sb
           + 2 * Cout * 4
           + 2 * Cout * L * 4                                   # out block x2
           + Cin_pad * Lp * sb
           + (0 if use_accum else n_taps * Cin_pad * L * sb))
    cp_kwargs = {"dimension_semantics": ("parallel",)}
    if est > 24 * 1024 * 1024:
        cp_kwargs["vmem_limit_bytes"] = min(2 * est, 64 * 1024 * 1024)

    z = pl.pallas_call(
        kernel,
        out_shape=jax.ShapeDtypeStruct((N, Cout, L), jnp.float32),
        grid=(N,),
        in_specs=[
            pl.BlockSpec((1, Cin, H * W), lambda n: (n, 0, 0)),
            w_spec,
            pl.BlockSpec((Cout, 1), lambda n: (0, 0)),
        ],
        out_specs=pl.BlockSpec((1, Cout, L), lambda n: (n, 0, 0)),
        scratch_shapes=scratch,
        compiler_params=pltpu.CompilerParams(**cp_kwargs),
    )(xf, w_arg, bsum)

    # Output is already NCHW; crop the padded junk columns.
    # TODO(synk): keep the padded layout for a fused consumer to skip this crop.
    return z.reshape(N, Cout, H, Wp)[:, :, :, :W]


def init_params(key, inplanes, num_classes, dilation_series):
    """Synthetic params matching nn.Conv2d(inplanes, num_classes, 3) per branch.

    Weights ~ N(0, 0.01) as in the module's __init__; biases ~ small uniform.
    Stored HWIO ([3, 3, Cin, Cout]).
    """
    params = []
    for i, _ in enumerate(dilation_series):
        kw, kb = jax.random.split(jax.random.fold_in(key, i))
        w = 0.01 * jax.random.normal(
            kw, (3, 3, inplanes, num_classes), dtype=jnp.float32)
        bound = 1.0 / jnp.sqrt(jnp.float32(inplanes * 3 * 3))
        b = jax.random.uniform(
            kb, (num_classes,), minval=-bound, maxval=bound, dtype=jnp.float32)
        params.append((w, b))
    return params


def _reference_forward(x_nchw, params, dilation_series, compute_dtype):
    """Pure-JAX reference (lax.conv_general_dilated) of the same early-return
    forward, with the same operand-dtype rounding as the kernel path."""
    x = x_nchw.astype(compute_dtype).astype(jnp.float32)

    def branch(i):
        d = int(dilation_series[i])
        w, b = params[i]
        w = w.astype(compute_dtype).astype(jnp.float32)
        y = jax.lax.conv_general_dilated(
            x, w,
            window_strides=(1, 1),
            padding=[(d, d), (d, d)],
            rhs_dilation=(d, d),
            dimension_numbers=("NCHW", "HWIO", "NCHW"),
            precision=jax.lax.Precision.HIGHEST,
        )
        return y + b.reshape(1, -1, 1, 1)

    return branch(0) + branch(1)  # early return after first loop iteration


if __name__ == "__main__":
    key = jax.random.PRNGKey(0)

    # (name, N, Cin, H, W, num_classes, dilation_series, force_accum)
    cases = [
        # Toy module shape: f32 staged path (Cin=4 -> channel-padded to 8).
        ("f32_staged", 2, 4, 16, 16, 8, [6, 12, 18, 24], False),
        # bf16 staged path (Cin % 16 == 0).
        ("bf16_staged", 2, 16, 16, 16, 8, [2, 4, 6, 8], False),
        # Per-tap accumulate path (the production / v7x form), forced on.
        ("bf16_accum", 2, 16, 16, 16, 8, [2, 4, 6, 8], True),
    ]

    for idx, (name, N, Cin, H, W, ncls, dil, facc) in enumerate(cases):
        kx, kp = jax.random.split(jax.random.fold_in(key, idx))
        x = jax.random.normal(kx, (N, Cin, H, W), dtype=jnp.float32)
        params = init_params(kp, Cin, ncls, dil)

        out = jax.block_until_ready(
            classifier_module_forward(x, params, dil, padding_series=dil,
                                      force_accum=facc))
        ref = jax.block_until_ready(
            _reference_forward(x, params, dil, _stage_dtype(Cin)))

        assert out.shape == (N, ncls, H, W), (name, out.shape)
        max_err = float(jnp.max(jnp.abs(out - ref)))
        assert jnp.allclose(out, ref, atol=2e-3, rtol=2e-3), \
            f"{name}: mismatch, max_err={max_err}"

    print("KERNEL_OK")
</pallas_src>

<mosaic_0001>
module attributes {stable_mosaic.version = 11 : i64} {
  func.func @kernel(%arg0: i32, %arg1: memref<1x4x256xf32, #tpu.memory_space<vmem>>, %arg2: memref<8x144xf32, #tpu.memory_space<vmem>>, %arg3: memref<8x1xf32, #tpu.memory_space<vmem>>, %arg4: memref<1x8x640xf32, #tpu.memory_space<vmem>>, %arg5: memref<8x1664xf32, #tpu.memory_space<vmem>>, %arg6: memref<144x640xf32, #tpu.memory_space<vmem>>) attributes {dimension_semantics = [#tpu.dimension_semantics<parallel>], iteration_bounds = array<i64: 2>, scalar_prefetch = 0 : i64, scratch_operands = 2 : i64, tpu.core_type = #tpu.core_type<tc>, window_params = [{transform_indices = @transform_0, window_bounds = array<i64: 1, 4, 256>}, {pipeline_mode = #tpu.pipeline_mode<synchronous>, transform_indices = @transform_1, window_bounds = array<i64: 8, 144>}, {pipeline_mode = #tpu.pipeline_mode<synchronous>, transform_indices = @transform_2, window_bounds = array<i64: 8, 1>}, {transform_indices = @transform_3, window_bounds = array<i64: 1, 8, 640>}]} {
    %c0 = arith.constant 0 : index
    %c0_0 = arith.constant 0 : index
    %c0_1 = arith.constant 0 : index
    %0 = vector.load %arg1[%c0, %c0_0, %c0_1] : memref<1x4x256xf32, #tpu.memory_space<vmem>>, vector<1x4x256xf32>
    %1 = vector.shape_cast %0 : vector<1x4x256xf32> to vector<4x256xf32>
    %cst = arith.constant 0.000000e+00 : f32
    %2 = vector.broadcast %cst : f32 to vector<8x1664xf32>
    %c0_2 = arith.constant 0 : index
    %c0_3 = arith.constant 0 : index
    %3 = vector.load %arg5[%c0_2, %c0_3] : memref<8x1664xf32, #tpu.memory_space<vmem>>, vector<8x1664xf32>
    tpu.vector_store %arg5[%c0_2, %c0_3], %2 {strides = array<i32>} : memref<8x1664xf32, #tpu.memory_space<vmem>>, vector<8x1664xf32>,
    %4 = vector.extract_strided_slice %1 {offsets = [0, 0], sizes = [4, 16], strides = [1, 1]} : vector<4x256xf32> to vector<4x16xf32>
    %c0_4 = arith.constant 0 : index
    %c492 = arith.constant 492 : index
    %5 = vector.load %arg5[%c0_4, %c492] : memref<8x1664xf32, #tpu.memory_space<vmem>>, vector<4x16xf32>
    tpu.vector_store %arg5[%c0_4, %c492], %4 {strides = array<i32>} : memref<8x1664xf32, #tpu.memory_space<vmem>>, vector<4x16xf32>,
    %6 = vector.extract_strided_slice %1 {offsets = [0, 16], sizes = [4, 16], strides = [1, 1]} : vector<4x256xf32> to vector<4x16xf32>
    %c0_5 = arith.constant 0 : index
    %c532 = arith.constant 532 : index
    %7 = vector.load %arg5[%c0_5, %c532] : memref<8x1664xf32, #tpu.memory_space<vmem>>, vector<4x16xf32>
    tpu.vector_store %arg5[%c0_5, %c532], %6 {strides = array<i32>} : memref<8x1664xf32, #tpu.memory_space<vmem>>, vector<4x16xf32>,
    %8 = vector.extract_strided_slice %1 {offsets = [0, 32], sizes = [4, 16], strides = [1, 1]} : vector<4x256xf32> to vector<4x16xf32>
    %c0_6 = arith.constant 0 : index
    %c572 = arith.constant 572 : index
    %9 = vector.load %arg5[%c0_6, %c572] : memref<8x1664xf32, #tpu.memory_space<vmem>>, vector<4x16xf32>
    tpu.vector_store %arg5[%c0_6, %c572], %8 {strides = array<i32>} : memref<8x1664xf32, #tpu.memory_space<vmem>>, vector<4x16xf32>,
    %10 = vector.extract_strided_slice %1 {offsets = [0, 48], sizes = [4, 16], strides = [1, 1]} : vector<4x256xf32> to vector<4x16xf32>
    %c0_7 = arith.constant 0 : index
    %c612 = arith.constant 612 : index
    %11 = vector.load %arg5[%c0_7, %c612] : memref<8x1664xf32, #tpu.memory_space<vmem>>, vector<4x16xf32>
    tpu.vector_store %arg5[%c0_7, %c612], %10 {strides = array<i32>} : memref<8x1664xf32, #tpu.memory_space<vmem>>, vector<4x16xf32>,
    %12 = vector.extract_strided_slice %1 {offsets = [0, 64], sizes = [4, 16], strides = [1, 1]} : vector<4x256xf32> to vector<4x16xf32>
    %c0_8 = arith.constant 0 : index
    %c652 = arith.constant 652 : index
    %13 = vector.load %arg5[%c0_8, %c652] : memref<8x1664xf32, #tpu.memory_space<vmem>>, vector<4x16xf32>
    tpu.vector_store %arg5[%c0_8, %c652], %12 {strides = array<i32>} : memref<8x1664xf32, #tpu.memory_space<vmem>>, vector<4x16xf32>,
    %14 = vector.extract_strided_slice %1 {offsets = [0, 80], sizes = [4, 16], strides = [1, 1]} : vector<4x256xf32> to vector<4x16xf32>
    %c0_9 = arith.constant 0 : index
    %c692 = arith.constant 692 : index
    %15 = vector.load %arg5[%c0_9, %c692] : memref<8x1664xf32, #tpu.memory_space<vmem>>, vector<4x16xf32>
    tpu.vector_store %arg5[%c0_9, %c692], %14 {strides = array<i32>} : memref<8x1664xf32, #tpu.memory_space<vmem>>, vector<4x16xf32>,
    %16 = vector.extract_strided_slice %1 {offsets = [0, 96], sizes = [4, 16], strides = [1, 1]} : vector<4x256xf32> to vector<4x16xf32>
    %c0_10 = arith.constant 0 : index
    %c732 = arith.constant 732 : index
    %17 = vector.load %arg5[%c0_10, %c732] : memref<8x1664xf32, #tpu.memory_space<vmem>>, vector<4x16xf32>
    tpu.vector_store %arg5[%c0_10, %c732], %16 {strides = array<i32>} : memref<8x1664xf32, #tpu.memory_space<vmem>>, vector<4x16xf32>,
    %18 = vector.extract_strided_slice %1 {offsets = [0, 112], sizes = [4, 16], strides = [1, 1]} : vector<4x256xf32> to vector<4x16xf32>
    %c0_11 = arith.constant 0 : index
    %c772 = arith.constant 772 : index
    %19 = vector.load %arg5[%c0_11, %c772] : memref<8x1664xf32, #tpu.memory_space<vmem>>, vector<4x16xf32>
    tpu.vector_store %arg5[%c0_11, %c772], %18 {strides = array<i32>} : memref<8x1664xf32, #tpu.memory_space<vmem>>, vector<4x16xf32>,
    %20 = vector.extract_strided_slice %1 {offsets = [0, 128], sizes = [4, 16], strides = [1, 1]} : vector<4x256xf32> to vector<4x16xf32>
    %c0_12 = arith.constant 0 : index
    %c812 = arith.constant 812 : index
    %21 = vector.load %arg5[%c0_12, %c812] : memref<8x1664xf32, #tpu.memory_space<vmem>>, vector<4x16xf32>
    tpu.vector_store %arg5[%c0_12, %c812], %20 {strides = array<i32>} : memref<8x1664xf32, #tpu.memory_space<vmem>>, vector<4x16xf32>,
    %22 = vector.extract_strided_slice %1 {offsets = [0, 144], sizes = [4, 16], strides = [1, 1]} : vector<4x256xf32> to vector<4x16xf32>
    %c0_13 = arith.constant 0 : index
    %c852 = arith.constant 852 : index
    %23 = vector.load %arg5[%c0_13, %c852] : memref<8x1664xf32, #tpu.memory_space<vmem>>, vector<4x16xf32>
    tpu.vector_store %arg5[%c0_13, %c852], %22 {strides = array<i32>} : memref<8x1664xf32, #tpu.memory_space<vmem>>, vector<4x16xf32>,
    %24 = vector.extract_strided_slice %1 {offsets = [0, 160], sizes = [4, 16], strides = [1, 1]} : vector<4x256xf32> to vector<4x16xf32>
    %c0_14 = arith.constant 0 : index
    %c892 = arith.constant 892 : index
    %25 = vector.load %arg5[%c0_14, %c892] : memref<8x1664xf32, #tpu.memory_space<vmem>>, vector<4x16xf32>
    tpu.vector_store %arg5[%c0_14, %c892], %24 {strides = array<i32>} : memref<8x1664xf32, #tpu.memory_space<vmem>>, vector<4x16xf32>,
    %26 = vector.extract_strided_slice %1 {offsets = [0, 176], sizes = [4, 16], strides = [1, 1]} : vector<4x256xf32> to vector<4x16xf32>
    %c0_15 = arith.constant 0 : index
    %c932 = arith.constant 932 : index
    %27 = vector.load %arg5[%c0_15, %c932] : memref<8x1664xf32, #tpu.memory_space<vmem>>, vector<4x16xf32>
    tpu.vector_store %arg5[%c0_15, %c932], %26 {strides = array<i32>} : memref<8x1664xf32, #tpu.memory_space<vmem>>, vector<4x16xf32>,
    %28 = vector.extract_strided_slice %1 {offsets = [0, 192], sizes = [4, 16], strides = [1, 1]} : vector<4x256xf32> to vector<4x16xf32>
    %c0_16 = arith.constant 0 : index
    %c972 = arith.constant 972 : index
    %29 = vector.load %arg5[%c0_16, %c972] : memref<8x1664xf32, #tpu.memory_space<vmem>>, vector<4x16xf32>
    tpu.vector_store %arg5[%c0_16, %c972], %28 {strides = array<i32>} : memref<8x1664xf32, #tpu.memory_space<vmem>>, vector<4x16xf32>,
    %30 = vector.extract_strided_slice %1 {offsets = [0, 208], sizes = [4, 16], strides = [1, 1]} : vector<4x256xf32> to vector<4x16xf32>
    %c0_17 = arith.constant 0 : index
    %c1012 = arith.constant 1012 : index
    %31 = vector.load %arg5[%c0_17, %c1012] : memref<8x1664xf32, #tpu.memory_space<vmem>>, vector<4x16xf32>
    tpu.vector_store %arg5[%c0_17, %c1012], %30 {strides = array<i32>} : memref<8x1664xf32, #tpu.memory_space<vmem>>, vector<4x16xf32>,
    %32 = vector.extract_strided_slice %1 {offsets = [0, 224], sizes = [4, 16], strides = [1, 1]} : vector<4x256xf32> to vector<4x16xf32>
    %c0_18 = arith.constant 0 : index
    %c1052 = arith.constant 1052 : index
    %33 = vector.load %arg5[%c0_18, %c1052] : memref<8x1664xf32, #tpu.memory_space<vmem>>, vector<4x16xf32>
    tpu.vector_store %arg5[%c0_18, %c1052], %32 {strides = array<i32>} : memref<8x1664xf32, #tpu.memory_space<vmem>>, vector<4x16xf32>,
    %34 = vector.extract_strided_slice %1 {offsets = [0, 240], sizes = [4, 16], strides = [1, 1]} : vector<4x256xf32> to vector<4x16xf32>
    %c0_19 = arith.constant 0 : index
    %c1092 = arith.constant 1092 : index
    %35 = vector.load %arg5[%c0_19, %c1092] : memref<8x1664xf32, #tpu.memory_space<vmem>>, vector<4x16xf32>
    tpu.vector_store %arg5[%c0_19, %c1092], %34 {strides = array<i32>} : memref<8x1664xf32, #tpu.memory_space<vmem>>, vector<4x16xf32>,
    %c0_20 = arith.constant 0 : index
    %c246 = arith.constant 246 : index
    %36 = vector.load %arg5[%c0_20, %c246] : memref<8x1664xf32, #tpu.memory_space<vmem>>, vector<8x640xf32>
    %c0_21 = arith.constant 0 : index
    %c0_22 = arith.constant 0 : index
    %37 = vector.load %arg6[%c0_21, %c0_22] : memref<144x640xf32, #tpu.memory_space<vmem>>, vector<8x640xf32>
    tpu.vector_store %arg6[%c0_21, %c0_22], %36 {strides = array<i32>} : memref<144x640xf32, #tpu.memory_space<vmem>>, vector<8x640xf32>,
    %c0_23 = arith.constant 0 : index
    %c252 = arith.constant 252 : index
    %38 = vector.load %arg5[%c0_23, %c252] : memref<8x1664xf32, #tpu.memory_space<vmem>>, vector<8x640xf32>
    %c8 = arith.constant 8 : index
    %c0_24 = arith.constant 0 : index
    %39 = vector.load %arg6[%c8, %c0_24] : memref<144x640xf32, #tpu.memory_space<vmem>>, vector<8x640xf32>
    tpu.vector_store %arg6[%c8, %c0_24], %38 {strides = array<i32>} : memref<144x640xf32, #tpu.memory_space<vmem>>, vector<8x640xf32>,
    %c0_25 = arith.constant 0 : index
    %c258 = arith.constant 258 : index
    %40 = vector.load %arg5[%c0_25, %c258] : memref<8x1664xf32, #tpu.memory_space<vmem>>, vector<8x640xf32>
    %c16 = arith.constant 16 : index
    %c0_26 = arith.constant 0 : index
    %41 = vector.load %arg6[%c16, %c0_26] : memref<144x640xf32, #tpu.memory_space<vmem>>, vector<8x640xf32>
    tpu.vector_store %arg6[%c16, %c0_26], %40 {strides = array<i32>} : memref<144x640xf32, #tpu.memory_space<vmem>>, vector<8x640xf32>,
    %c0_27 = arith.constant 0 : index
    %c486 = arith.constant 486 : index
    %42 = vector.load %arg5[%c0_27, %c486] : memref<8x1664xf32, #tpu.memory_space<vmem>>, vector<8x640xf32>
    %c24 = arith.constant 24 : index
    %c0_28 = arith.constant 0 : index
    %43 = vector.load %arg6[%c24, %c0_28] : memref<144x640xf32, #tpu.memory_space<vmem>>, vector<8x640xf32>
    tpu.vector_store %arg6[%c24, %c0_28], %42 {strides = array<i32>} : memref<144x640xf32, #tpu.memory_space<vmem>>, vector<8x640xf32>,
    %c0_29 = arith.constant 0 : index
    %c492_30 = arith.constant 492 : index
    %44 = vector.load %arg5[%c0_29, %c492_30] : memref<8x1664xf32, #tpu.memory_space<vmem>>, vector<8x640xf32>
    %c32 = arith.constant 32 : index
    %c0_31 = arith.constant 0 : index
    %45 = vector.load %arg6[%c32, %c0_31] : memref<144x640xf32, #tpu.memory_space<vmem>>, vector<8x640xf32>
    tpu.vector_store %arg6[%c32, %c0_31], %44 {strides = array<i32>} : memref<144x640xf32, #tpu.memory_space<vmem>>, vector<8x640xf32>,
    %c0_32 = arith.constant 0 : index
    %c498 = arith.constant 498 : index
    %46 = vector.load %arg5[%c0_32, %c498] : memref<8x1664xf32, #tpu.memory_space<vmem>>, vector<8x640xf32>
    %c40 = arith.constant 40 : index
    %c0_33 = arith.constant 0 : index
    %47 = vector.load %arg6[%c40, %c0_33] : memref<144x640xf32, #tpu.memory_space<vmem>>, vector<8x640xf32>
    tpu.vector_store %arg6[%c40, %c0_33], %46 {strides = array<i32>} : memref<144x640xf32, #tpu.memory_space<vmem>>, vector<8x640xf32>,
    %c0_34 = arith.constant 0 : index
    %c726 = arith.constant 726 : index
    %48 = vector.load %arg5[%c0_34, %c726] : memref<8x1664xf32, #tpu.memory_space<vmem>>, vector<8x640xf32>
    %c48 = arith.constant 48 : index
    %c0_35 = arith.constant 0 : index
    %49 = vector.load %arg6[%c48, %c0_35] : memref<144x640xf32, #tpu.memory_space<vmem>>, vector<8x640xf32>
    tpu.vector_store %arg6[%c48, %c0_35], %48 {strides = array<i32>} : memref<144x640xf32, #tpu.memory_space<vmem>>, vector<8x640xf32>,
    %c0_36 = arith.constant 0 : index
    %c732_37 = arith.constant 732 : index
    %50 = vector.load %arg5[%c0_36, %c732_37] : memref<8x1664xf32, #tpu.memory_space<vmem>>, vector<8x640xf32>
    %c56 = arith.constant 56 : index
    %c0_38 = arith.constant 0 : index
    %51 = vector.load %arg6[%c56, %c0_38] : memref<144x640xf32, #tpu.memory_space<vmem>>, vector<8x640xf32>
    tpu.vector_store %arg6[%c56, %c0_38], %50 {strides = array<i32>} : memref<144x640xf32, #tpu.memory_space<vmem>>, vector<8x640xf32>,
    %c0_39 = arith.constant 0 : index
    %c738 = arith.constant 738 : index
    %52 = vector.load %arg5[%c0_39, %c738] : memref<8x1664xf32, #tpu.memory_space<vmem>>, vector<8x640xf32>
    %c64 = arith.constant 64 : index
    %c0_40 = arith.constant 0 : index
    %53 = vector.load %arg6[%c64, %c0_40] : memref<144x640xf32, #tpu.memory_space<vmem>>, vector<8x640xf32>
    tpu.vector_store %arg6[%c64, %c0_40], %52 {strides = array<i32>} : memref<144x640xf32, #tpu.memory_space<vmem>>, vector<8x640xf32>,
    %c0_41 = arith.constant 0 : index
    %c0_42 = arith.constant 0 : index
    %54 = vector.load %arg5[%c0_41, %c0_42] : memref<8x1664xf32, #tpu.memory_space<vmem>>, vector<8x640xf32>
    %c72 = arith.constant 72 : index
    %c0_43 = arith.constant 0 : index
    %55 = vector.load %arg6[%c72, %c0_43] : memref<144x640xf32, #tpu.memory_space<vmem>>, vector<8x640xf32>
    tpu.vector_store %arg6[%c72, %c0_43], %54 {strides = array<i32>} : memref<144x640xf32, #tpu.memory_space<vmem>>, vector<8x640xf32>,
    %c0_44 = arith.constant 0 : index
    %c12 = arith.constant 12 : index
    %56 = vector.load %arg5[%c0_44, %c12] : memref<8x1664xf32, #tpu.memory_space<vmem>>, vector<8x640xf32>
    %c80 = arith.constant 80 : index
    %c0_45 = arith.constant 0 : index
    %57 = vector.load %arg6[%c80, %c0_45] : memref<144x640xf32, #tpu.memory_space<vmem>>, vector<8x640xf32>
    tpu.vector_store %arg6[%c80, %c0_45], %56 {strides = array<i32>} : memref<144x640xf32, #tpu.memory_space<vmem>>, vector<8x640xf32>,
    %c0_46 = arith.constant 0 : index
    %c24_47 = arith.constant 24 : index
    %58 = vector.load %arg5[%c0_46, %c24_47] : memref<8x1664xf32, #tpu.memory_space<vmem>>, vector<8x640xf32>
    %c88 = arith.constant 88 : index
    %c0_48 = arith.constant 0 : index
    %59 = vector.load %arg6[%c88, %c0_48] : memref<144x640xf32, #tpu.memory_space<vmem>>, vector<8x640xf32>
    tpu.vector_store %arg6[%c88, %c0_48], %58 {strides = array<i32>} : memref<144x640xf32, #tpu.memory_space<vmem>>, vector<8x640xf32>,
    %c0_49 = arith.constant 0 : index
    %c480 = arith.constant 480 : index
    %60 = vector.load %arg5[%c0_49, %c480] : memref<8x1664xf32, #tpu.memory_space<vmem>>, vector<8x640xf32>
    %c96 = arith.constant 96 : index
    %c0_50 = arith.constant 0 : index
    %61 = vector.load %arg6[%c96, %c0_50] : memref<144x640xf32, #tpu.memory_space<vmem>>, vector<8x640xf32>
    tpu.vector_store %arg6[%c96, %c0_50], %60 {strides = array<i32>} : memref<144x640xf32, #tpu.memory_space<vmem>>, vector<8x640xf32>,
    %c0_51 = arith.constant 0 : index
    %c492_52 = arith.constant 492 : index
    %62 = vector.load %arg5[%c0_51, %c492_52] : memref<8x1664xf32, #tpu.memory_space<vmem>>, vector<8x640xf32>
    %c104 = arith.constant 104 : index
    %c0_53 = arith.constant 0 : index
    %63 = vector.load %arg6[%c104, %c0_53] : memref<144x640xf32, #tpu.memory_space<vmem>>, vector<8x640xf32>
    tpu.vector_store %arg6[%c104, %c0_53], %62 {strides = array<i32>} : memref<144x640xf32, #tpu.memory_space<vmem>>, vector<8x640xf32>,
    %c0_54 = arith.constant 0 : index
    %c504 = arith.constant 504 : index
    %64 = vector.load %arg5[%c0_54, %c504] : memref<8x1664xf32, #tpu.memory_space<vmem>>, vector<8x640xf32>
    %c112 = arith.constant 112 : index
    %c0_55 = arith.constant 0 : index
    %65 = vector.load %arg6[%c112, %c0_55] : memref<144x640xf32, #tpu.memory_space<vmem>>, vector<8x640xf32>
    tpu.vector_store %arg6[%c112, %c0_55], %64 {strides = array<i32>} : memref<144x640xf32, #tpu.memory_space<vmem>>, vector<8x640xf32>,
    %c0_56 = arith.constant 0 : index
    %c960 = arith.constant 960 : index
    %66 = vector.load %arg5[%c0_56, %c960] : memref<8x1664xf32, #tpu.memory_space<vmem>>, vector<8x640xf32>
    %c120 = arith.constant 120 : index
    %c0_57 = arith.constant 0 : index
    %67 = vector.load %arg6[%c120, %c0_57] : memref<144x640xf32, #tpu.memory_space<vmem>>, vector<8x640xf32>
    tpu.vector_store %arg6[%c120, %c0_57], %66 {strides = array<i32>} : memref<144x640xf32, #tpu.memory_space<vmem>>, vector<8x640xf32>,
    %c0_58 = arith.constant 0 : index
    %c972_59 = arith.constant 972 : index
    %68 = vector.load %arg5[%c0_58, %c972_59] : memref<8x1664xf32, #tpu.memory_space<vmem>>, vector<8x640xf32>
    %c128 = arith.constant 128 : index
    %c0_60 = arith.constant 0 : index
    %69 = vector.load %arg6[%c128, %c0_60] : memref<144x640xf32, #tpu.memory_space<vmem>>, vector<8x640xf32>
    tpu.vector_store %arg6[%c128, %c0_60], %68 {strides = array<i32>} : memref<144x640xf32, #tpu.memory_space<vmem>>, vector<8x640xf32>,
    %c0_61 = arith.constant 0 : index
    %c984 = arith.constant 984 : index
    %70 = vector.load %arg5[%c0_61, %c984] : memref<8x1664xf32, #tpu.memory_space<vmem>>, vector<8x640xf32>
    %c136 = arith.constant 136 : index
    %c0_62 = arith.constant 0 : index
    %71 = vector.load %arg6[%c136, %c0_62] : memref<144x640xf32, #tpu.memory_space<vmem>>, vector<8x640xf32>
    tpu.vector_store %arg6[%c136, %c0_62], %70 {strides = array<i32>} : memref<144x640xf32, #tpu.memory_space<vmem>>, vector<8x640xf32>,
    %c0_63 = arith.constant 0 : index
    %c0_64 = arith.constant 0 : index
    %72 = vector.load %arg2[%c0_63, %c0_64] : memref<8x144xf32, #tpu.memory_space<vmem>>, vector<8x144xf32>
    %c0_65 = arith.constant 0 : index
    %c0_66 = arith.constant 0 : index
    %73 = vector.load %arg6[%c0_65, %c0_66] : memref<144x640xf32, #tpu.memory_space<vmem>>, vector<144x640xf32>
    %cst_67 = arith.constant dense<0.000000e+00> : vector<8x640xf32>
    %74 = tpu.matmul %72, %73, %cst_67 {dimension_numbers = #tpu.dot_dimension_numbers<[1], [0], [0], [1], [0, 0, 1, 1], [], []>} : vector<8x144xf32>, vector<144x640xf32>, vector<8x640xf32> -> vector<8x640xf32>
    %c0_68 = arith.constant 0 : index
    %c0_69 = arith.constant 0 : index
    %75 = vector.load %arg3[%c0_68, %c0_69] : memref<8x1xf32, #tpu.memory_space<vmem>>, vector<8x1xf32>
    %76 = vector.broadcast %75 : vector<8x1xf32> to vector<8x640xf32>
    %77 = arith.addf %74, %76 : vector<8x640xf32>
    %c0_70 = arith.constant 0 : index
    %c0_71 = arith.constant 0 : index
    %c0_72 = arith.constant 0 : index
    %78 = vector.load %arg4[%c0_70, %c0_71, %c0_72] : memref<1x8x640xf32, #tpu.memory_space<vmem>>, vector<1x8x640xf32>
    %79 = vector.shape_cast %78 : vector<1x8x640xf32> to vector<8x640xf32>
    %80 = vector.shape_cast %77 : vector<8x640xf32> to vector<1x8x640xf32>
    tpu.vector_store %arg4[%c0_70, %c0_71, %c0_72], %80 {strides = array<i32>} : memref<1x8x640xf32, #tpu.memory_space<vmem>>, vector<1x8x640xf32>,
    return
  }
  func.func @transform_0(%arg0: i32) -> (i32, i32, i32) {
    %c0_i32 = arith.constant 0 : i32
    %c0_i32_0 = arith.constant 0 : i32
    %c0_i32_1 = arith.constant 0 : i32
    return %arg0, %c0_i32, %c0_i32_0 : i32, i32, i32
  }
  func.func @transform_1(%arg0: i32) -> (i32, i32) {
    %c0_i32 = arith.constant 0 : i32
    %c0_i32_0 = arith.constant 0 : i32
    %c0_i32_1 = arith.constant 0 : i32
    return %c0_i32, %c0_i32_0 : i32, i32
  }
  func.func @transform_2(%arg0: i32) -> (i32, i32) {
    %c0_i32 = arith.constant 0 : i32
    %c0_i32_0 = arith.constant 0 : i32
    %c0_i32_1 = arith.constant 0 : i32
    return %c0_i32, %c0_i32_0 : i32, i32
  }
  func.func @transform_3(%arg0: i32) -> (i32, i32, i32) {
    %c0_i32 = arith.constant 0 : i32
    %c0_i32_0 = arith.constant 0 : i32
    %c0_i32_1 = arith.constant 0 : i32
    return %arg0, %c0_i32, %c0_i32_0 : i32, i32, i32
  }
}

</mosaic_0001>

<bundles_post_ra>
// kernel: tpu_custom_call.1
= control target key start
LH: loop header
LB: loop body
LE: loop exit
PB: predicated region body
PF: predicated region fallthrough
CT: control target
= control target key end

     0   :  { %8 = vsyncpa [#allocation5], 0  ;;  %s2391_s0 = inlined_call_operand.hbm [shape: f32[2,4,256], index: 0, kind: input, shape index: {}]   ;;  %s2392_s1 = inlined_call_operand.hbm [shape: f32[8,144], index: 1, kind: input, shape index: {}]   ;;  %s2393_s2 = inlined_call_operand.vmem [shape: f32[8,1], index: 2, kind: input, shape index: {}]   ;;  %s2394_s3 = inlined_call_operand.hbm [shape: f32[2,8,640], index: 3, kind: output, shape index: {}]  }
   0x1   :  { %10 = vsyncpa [#allocation5 + $0x1], 0 }
   0x2   :  { %11 = vsyncpa [#allocation8], 0 }
   0x3   :  { %12 = vsyncpa [#allocation6], 0 }
   0x4   :  { %14 = vsyncpa [#allocation6 + $0x1], 0  ;;  %s1687_s12 = smov 0   ;;  %s1689_s13 = smov 0  }
   0x5   :  { %s1691_s14 = smov 0   ;;  %s1693_s15 = smov 0  }
   0x6 LB: > { %s1708_s16 = sadd.s32 4294967295, %s1633_s15   ;;  %s1403_s17 = sadd.s32 4294967294, %s1633_s15   ;;  %s1633_s15 = sphi %s1693_s15, %s2421_s15   ;;  %s1629_s14 = sphi %s1691_s14, %s2420_s14   ;;  %s1625_s13 = sphi %s1689_s13, %s2419_s13   ;;  %s1621_s12 = sphi %s1687_s12, %s2418_s12  }
   0x7   : > { %p40_p0 = scmp.ne.s32.totalorder %s1625_s13, %s1621_s12  ;;  %p2395_p1 = scmp.eq.s32.totalorder %s1708_s16, 0 }
   0x8   : > { %p112_p3 = scmp.eq.s32.totalorder %s1403_s17, 1  ;;  %p1404_p5 = scmp.ge.s32.totalorder %s1633_s15, 1 }
   0x9   : > { %p1717_p4 = por %p2395_p1, %p40_p0  ;;  %p119_p7 = scmp.lt.s32.totalorder %s1633_s15, 3 }
   0xa   : > { %p1722_p6 = por %p112_p3, %p40_p0  ;;  %s1635_s21 = smov [#allocation7]  }
   0xb   : > { %s2400_s18 = scalar_select %p1717_p4, 1, 0 }
   0xc   : > { %s2401_s19 = scalar_select %p1722_p6, 1, 0 }
   0xd   : > { %p1727_p8 = pnand %p1404_p5, %p119_p7  ;;  %s132_s22 = sshll.u32 %s1635_s21, 4  ;;  %s133_s22 = int_to_ptr.vmem [resolvable:$true] %s132_s22 }
   0xe   : > { %s1735_s23 = sadd.s32 1, %s1633_s15   ;;  %s27_s27 = sadd.s32 1, %s1629_s14 }
   0xf   : > { %s2402_s20 = scalar_select %p1727_p8, 1, 0 }
  0x10   : > { %p1430_p10 = pneg %p1727_p8  ;;  %s24_s25 = ssub.s32 %s1633_s15, %s1735_s23 }
  0x11   : > { %p1745_p12 = scmp.eq.s32.totalorder %s24_s25, 0  ;;  %p34_p13 = scmp.ne.s32.totalorder %s1629_s14, %s1625_s13 }
  0x12   : > { %p1739_p11 = pnand %p1430_p10, %p2395_p1  ;;  %s1522_s28 = scalar_lea.vmem %s133_s22, 256 }
  0x13   : > { %p1523_p3 = scmp.ne.s32.totalorder %s133_s22, %s1522_s28  ;;  %p1530_p9 = scmp.lt.s32.totalorder %s133_s22, %s133_s22 }
  0x14   : > { %p1513_p0 = pneg %p1739_p11  ;;  %p1531_p2 = scmp.lt.s32.totalorder %s1522_s28, %s1522_s28 }
  0x16   : > { %p1525_p5 = pnand %p1523_p3, %p1513_p0  ;;  %p1532_p10 = por %p1531_p2, %p1530_p9 }
  0x18   : > { %p1526_p7 = pneg %p1525_p5 }
  0x1a   : > { %p1533_p1 = pnand %p1532_p10, %p1526_p7 }
  0x1c   : > { %1536 = shalt.err (!%p1533_p1)
}
  0x1d   : > { %1433 = dma.hbm_to_vmem [thread:$0]  (!%p1739_p11), %s2392_s1, 256, %s133_s22, [#allocation8]  }
  0x1e   : > { %s1762_s4 = scalar_select %p1745_p12, %s1629_s14, %s27_s27  }
  0x1f   : > { %p35_p1 = scmp.eq.s32.totalorder %s1633_s15, 0  ;;  %p2405_p2 = scmp.eq.s32.totalorder %s1708_s16, 1 }
  0x20   : > { %p1443_p0 = scmp.lt.s32.totalorder %s1633_s15, 2  ;;  %s146_s6 = sand.u32 1, %s1629_s14  }
  0x21   : > { %p1770_p9 = por %p2405_p2, %p34_p13  ;;  %p36_p3 = por %p35_p1, %p34_p13 }
  0x22   : > { %s1407_s7 = sshll.u32 %s146_s6, 3  ;;  %s1419_s8 = sshll.u32 %s1633_s15, 7 }
  0x23   : > { %s2406_s5 = scalar_select %p1770_p9, 1, 0 }
  0x24   : > { %s1783_s11 = scalar_lea.hbm %s2391_s0, %s1419_s8  ;;  %s150_s17 = scalar_lea.vmem [#allocation4], %s1407_s7 }
  0x25   : > { %s158_s21 = sshll.u32 %s150_s17, 4  ;;  %p1785_p11 = pnand %p1443_p0, %p36_p3  ;;  %s159_s21 = int_to_ptr.vmem [resolvable:$true] %s158_s21 }
  0x26   : > { %s147_s24 = scalar_lea.sflag [#allocation5], %s146_s6  ;;  %s1537_s25 = scalar_lea.hbm %s1783_s11, 128 }
  0x27   : > { %p1538_p12 = scmp.ne.s32.totalorder %s1783_s11, %s1537_s25  ;;  %p1539_p13 = pneg %p1785_p11 }
  0x28   : > { %s1542_s28 = scalar_lea.hbm %s2391_s0, 256  ;;  %p1543_p10 = scmp.lt.s32.totalorder %s1783_s11, %s2391_s0 }
  0x29   : > { %p1540_p5 = pnand %p1539_p13, %p1538_p12  ;;  %p1544_p1 = scmp.lt.s32.totalorder %s1542_s28, %s1537_s25 }
  0x2b   : > { %p1541_p7 = pneg %p1540_p5  ;;  %p1545_p2 = por %p1544_p1, %p1543_p10 }
  0x2d   : > { %p1546_p0 = pnand %p1545_p2, %p1541_p7 }
  0x2f   : > { %1549 = shalt.err (!%p1546_p0)
}
  0x30   : > { %s1550_s7 = scalar_lea.vmem %s159_s21, 128  ;;  %s1636_s6 = smov [#allocation4]  }
  0x31   : > { %p1551_p3 = scmp.ne.s32.totalorder %s159_s21, %s1550_s7  ;;  %s1555_s8 = sshll.u32 %s1636_s6, 4  ;;  %s1556_s8 = int_to_ptr.vmem [resolvable:$false] %s1555_s8 }
  0x32   : > { %s1557_s9 = scalar_lea.vmem %s1556_s8, 256  ;;  %p1558_p12 = scmp.lt.s32.totalorder %s159_s21, %s1556_s8 }
  0x33   : > { %p1553_p6 = pnand %p1551_p3, %p1539_p13  ;;  %p1559_p5 = scmp.lt.s32.totalorder %s1557_s9, %s1550_s7 }
  0x35   : > { %p1554_p9 = pneg %p1553_p6  ;;  %p1560_p4 = por %p1559_p5, %p1558_p12 }
  0x37   : > { %p1561_p8 = pnand %p1560_p4, %p1554_p9 }
  0x39   : > { %1564 = shalt.err (!%p1561_p8)
}
  0x3a   : > { %1437 = dma.hbm_to_vmem [thread:$0]  (!%p1785_p11), %s1783_s11, 128, %s159_s21, %s147_s24  }
  0x3b   : > { %p2408_p7 = scmp.ne.s32.totalorder %s2402_s20, 0 }
  0x3c   : > { %s1806_s10 = sand.u32 (!%p2408_p7), 1, %s1625_s13   ;;  %p2409_p6 = scmp.ne.s32.totalorder (!%p2408_p7), %s2400_s18, 0 }
  0x3d   : > { %167 = sbr.rel (%p2408_p7) target bundleno = 713 (0x2c9), region = 32  ;;  %s1411_s17 = sshll.u32 (!%p2408_p7), %s1806_s10, 3 }
  0x3e   : > { %s170_s25 = scalar_lea.sflag (!%p2408_p7), [#allocation5], %s1806_s10  ;;  %s173_s26 = scalar_lea.vmem (!%p2408_p7), [#allocation4], %s1411_s17 }
  0x42   : > { %1608 = dma.done.wait (%p2409_p6), %s170_s25, 128  }
  0x43   : > { %1610 = vsyncadd (%p2409_p6), %s170_s25, 4294967168  ;;  %p2410_p4 = scmp.eq.s32.totalorder %s1708_s16, 0 }
  0x45   : > { %1612 = dma.done.wait (%p2410_p4), [#allocation8], 256   ;;  %p2411_p8 = pmov %p2410_p4 }
  0x46   : > { %v1637_v0 = vmov 0.0   ;;  %v200_v1 = vld [vmem:[%s173_s26] sm:$0xff]  ;;  %s1638_s18 = smov 4   ;;  %s1639_s20 = smov 76   ;;  %vm223_vm0 = vcmask 289952   ;;  %vm238_vm1 = vcmask 224352  }
  0x47   : > { %1614 = vsyncadd (%p2411_p8), [#allocation8], 4294967040  ;;  %202 = vst [vmem:[#allocation2 + $0x8] sm:$0xff] %v1637_v0  ;;  %220 = vrot.lane.b32.xlu0 %v200_v1, %s1638_s18  ;;  %235 = vrot.lane.b32.xlu1 %v200_v1, %s1639_s20  ;;  %v255_v2 = vcombine.high %v200_v1, %v200_v1  ;;  %s1640_s11 = smov 92   ;;  %s1641_s21 = smov 116   ;;  %vm271_vm2 = vcmask 93184  }
  0x48   : > { %204 = vst [vmem:[#allocation2 + $0x18] sm:$0xff] %v1637_v0  ;;  %205 = vst [vmem:[#allocation2 + $0x20] sm:$0xff] %v1637_v0  ;;  %s1642_s22 = smov 36   ;;  %s1643_s24 = smov 60   ;;  %vm276_vm3 = vcmask 421152   ;;  %vm288_vm4 = vcmask 27648  }
  0x49   : > { %206 = vst [vmem:[#allocation2 + $0x28] sm:$0xff] %v1637_v0  ;;  %207 = vst [vmem:[#allocation2 + $0x30] sm:$0xff] %v1637_v0  ;;  %s1644_s27 = smov 12   ;;  %s1645_s28 = smov 84   ;;  %vm293_vm5 = vcmask 355552   ;;  %vm281_vm6 = vcmask 749152  }
  0x4a   : > { %208 = vst [vmem:[#allocation2 + $0x38] sm:$0xff] %v1637_v0  ;;  %209 = vst [vmem:[#allocation2 + $0x40] sm:$0xff] %v1637_v0  ;;  %s1646_s29 = smov 28   ;;  %s1647_s30 = smov 100   ;;  %vm298_vm7 = vcmask 683552   ;;  %vm286_vm8 = vcmask 1044384  }
  0x4b   : > { %266 = vrot.lane.b32.xlu0 %v255_v2, %s1640_s11  ;;  %273 = vrot.lane.b32.xlu1 %v255_v2, %s1641_s21  ;;  %s1648_s7 = smov 52   ;;  %s1649_s6 = smov 124   ;;  %vm228_vm9 = vcmask 617952   ;;  %vm243_vm10 = vcmask 552352   ;;  %vm233_vm11 = vcmask 945952   ;;  %vm248_vm12 = vcmask 880352  }
  0x4c   : > { %s1650_s8 = smov 108   ;;  %s1651_s9 = smov 20   ;;  %vm218_vm13 = vcmask 1011552   ;;  %vm253_vm14 = vcmask 158752   ;;  %vm259_vm15 = vcmask 486752   ;;  %v1996_v43 = vld [vmem:[#allocation7 + $0x8] sm:$0xff] }
  0x4d   : > { %s1652_s17 = smov 44   ;;  %s1653_s25 = smov 68  }
  0x4e   : > { %s1654_s26 = smov 104   ;;  %s1655_s20 = smov 64  }
  0x4f   : > { %283 = vrot.lane.b32.xlu0 %v255_v2, %s1642_s22  ;;  %290 = vrot.lane.b32.xlu1 %v255_v2, %s1643_s24  ;;  %s1656_s11 = smov 126   ;;  %s1657_s24 = smov 10  }
  0x50   : > { %p2415_p11 = scmp.ne.s32.totalorder %s2406_s5, 0 }
  0x53   : > { %278 = vrot.lane.b32.xlu0 %v255_v2, %s1644_s27  ;;  %295 = vrot.lane.b32.xlu1 %v255_v2, %s1645_s28  ;;  %s1658_s27 = smov 40   ;;  %s1659_s28 = smov 8  }
  0x57   : > { %225 = vrot.lane.b32.xlu0 %v200_v1, %s1646_s29  ;;  %240 = vrot.lane.b32.xlu1 %v200_v1, %s1647_s30  ;;  %s1660_s29 = smov 32   ;;  %s1661_s30 = smov 14  }
  0x5b   : > { %230 = vrot.lane.b32.xlu0 %v200_v1, %s1648_s7  ;;  %245 = vrot.lane.b32.xlu1 %v200_v1, %s1649_s6  ;;  %s1662_s6 = smov 26  }
  0x5f   : > { %215 = vrot.lane.b32.xlu0 %v200_v1, %s1650_s8  ;;  %250 = vrot.lane.b32.xlu1 %v200_v1, %s1651_s9  ;;  %s1663_s8 = smov 30  }
  0x63   : > { %256 = vrot.lane.b32.xlu0 %v255_v2, %s1652_s17  ;;  %261 = vrot.lane.b32.xlu1 %v255_v2, %s1653_s25  ;;  %s1664_s17 = smov 42  }
  0x67   : > { %724 = vrot.lane.b32.xlu0 %v1637_v0, %s1654_s26  ;;  %885 = vrot.lane.b32.xlu1 %v1637_v0, %s1655_s20 }
  0x6b   : > { %722 = vrot.lane.b32.xlu0 %v1637_v0, %s1654_s26  ;;  %726 = vrot.lane.b32.xlu1 %v1637_v0, %s1654_s26 }
  0x6f   : > { %686 = vrot.lane.b32.xlu0 %v1637_v0, %s1641_s21  ;;  %684 = vrot.lane.b32.xlu1 %v1637_v0, %s1641_s21 }
  0x73   : > { %392 = vrot.lane.b32.xlu0 %v1637_v0, %s1656_s11  ;;  %682 = vrot.lane.b32.xlu1 %v1637_v0, %s1641_s21 }
  0x77   : > { %314 = vrot.lane.b32.xlu0 %v1637_v0, %s1657_s24  ;;  %354 = vrot.lane.b32.xlu1 %v1637_v0, %s1638_s18 }
  0x7b   : > { %312 = vrot.lane.b32.xlu0 %v1637_v0, %s1657_s24  ;;  %352 = vrot.lane.b32.xlu1 %v1637_v0, %s1638_s18 }
  0x7f   : > { %965 = vrot.lane.b32.xlu0 %v1637_v0, %s1658_s27  ;;  %889 = vrot.lane.b32.xlu1 %v1637_v0, %s1655_s20 }
  0x83   : > { %887 = vrot.lane.b32.xlu0 %v1637_v0, %s1655_s20  ;;  %925 = vrot.lane.b32.xlu1 %v1637_v0, %s1648_s7 }
  0xb9   : > { %v221_v3 = vpop.permute.xlu0 %220  ;;  %v236_v4 = vpop.permute.xlu1 %235 }
  0xba   : > { %224 = vst.msk [vmem:[#allocation2 + $0x20] sm:$0xf] %vm223_vm0, %v221_v3  ;;  %vm264_vm0 = vcmask 814752  }
  0xbb   : > { %239 = vst.msk [vmem:[#allocation2 + $0x28] sm:$0xf] %vm238_vm1, %v236_v4  ;;  %vm269_vm1 = vcmask 1044448  }
  0xbd   : > { %v267_v5 = vpop.permute.xlu0 %266  ;;  %v274_v6 = vpop.permute.xlu1 %273 }
  0xbe   : > { %272 = vst.msk [vmem:[#allocation2 + $0x38] sm:$0xf] %vm271_vm2, %v267_v5  ;;  %vm694_vm2 = vcmask 949248  }
  0xbf   : > { %277 = vst.msk [vmem:[#allocation2 + $0x38] sm:$0xf] %vm276_vm3, %v274_v6  ;;  %vm893_vm3 = vcmask 523264   ;;  %v1665_v6 = vmov 0  }
  0xc0   : > { %1508 = vset.pattern.permute.xlu0 %v1665_v6 }
  0xc1   : > { %v284_v7 = vpop.permute.xlu0 %283  ;;  %v291_v8 = vpop.permute.xlu1 %290 }
  0xc2   : > { %289 = vst.msk [vmem:[#allocation2 + $0x40] sm:$0xf] %vm288_vm4, %v284_v7  ;;  %vm1087_vm4 = vcmask 130048  }
  0xc3   : > { %294 = vst.msk [vmem:[#allocation2 + $0x40] sm:$0xf] %vm293_vm5, %v291_v8  ;;  %1413 = vmatprep.mubr.msk.f32.mxu0 %vm1087_vm4, %v1996_v43  ;;  %1414 = vmatprep.mubr.msk.f32.mxu1 %vm1087_vm4, %v1996_v43  ;;  %vm853_vm5 = vcmask 64512  }
  0xc5   : > { %v279_v9 = vpop.permute.xlu0 %278  ;;  %v296_v10 = vpop.permute.xlu1 %295 }
  0xc6   : > { %282 = vst.msk [vmem:[#allocation2 + $0x38] sm:$0xf] %vm281_vm6, %v279_v9  ;;  %vm484_vm6 = vcmask 162816  }
  0xc7   : > { %299 = vst.msk [vmem:[#allocation2 + $0x40] sm:$0xf] %vm298_vm7, %v296_v10  ;;  %vm774_vm7 = vcmask 261120  }
  0xc8   : > { %287 = vst.msk [vmem:[#allocation2 + $0x38] sm:$0xf] %vm286_vm8, %v284_v7  ;;  %vm734_vm8 = vcmask 850944  }
  0xc9   : > { %v226_v11 = vpop.permute.xlu0 %225  ;;  %v241_v12 = vpop.permute.xlu1 %240 }
  0xca   : > { %229 = vst.msk [vmem:[#allocation2 + $0x20] sm:$0xf] %vm228_vm9, %v226_v11  ;;  %vm644_vm9 = vcmask 244736  }
  0xcb   : > { %244 = vst.msk [vmem:[#allocation2 + $0x28] sm:$0xf] %vm243_vm10, %v241_v12  ;;  %v1081_v12 = vld [vmem:[%s2393_s2] sm:$0xff]  ;;  %vm604_vm10 = vcmask 293888  }
  0xcd   : > { %v231_v13 = vpop.permute.xlu0 %230  ;;  %v246_v14 = vpop.permute.xlu1 %245 }
  0xce   : > { %234 = vst.msk [vmem:[#allocation2 + $0x20] sm:$0xf] %vm233_vm11, %v231_v13  ;;  %v1950_v40 = vld [vmem:[#allocation2 + $0x40] sm:$0xff]  ;;  %vm564_vm11 = vcmask 343040  }
  0xcf   : > { %249 = vst.msk [vmem:[#allocation2 + $0x28] sm:$0xf] %vm248_vm12, %v246_v14  ;;  %v1970_v42 = vld [vmem:[#allocation2 + $0x38] sm:$0xff]  ;;  %vm524_vm12 = vcmask 113664  }
  0xd1   : > { %v216_v15 = vpop.permute.xlu0 %215  ;;  %v251_v16 = vpop.permute.xlu1 %250 }
  0xd2   : > { %219 = vst.msk [vmem:[#allocation2 + $0x18] sm:$0xf] %vm218_vm13, %v216_v15  ;;  %vm444_vm13 = vcmask 211968  }
  0xd3   : > { %254 = vst.msk [vmem:[#allocation2 + $0x30] sm:$0xf] %vm253_vm14, %v251_v16  ;;  %vm2399_vm14 = vcmask 1031168  }
  0xd5   : > { %v257_v17 = vpop.permute.xlu0 %256  ;;  %v262_v18 = vpop.permute.xlu1 %261  ;;  %v1908_v32 = vld [vmem:[#allocation2 + $0x20] sm:$0xff] }
  0xd6   : > { %260 = vst.msk [vmem:[#allocation2 + $0x30] sm:$0xf] %vm259_vm15, %v257_v17  ;;  %v1898_v29 = vld [vmem:[#allocation2 + $0x28] sm:$0xff]  ;;  %vm364_vm15 = vcmask 31744  }
  0xd7   : > { %265 = vst.msk [vmem:[#allocation2 + $0x30] sm:$0xf] %vm264_vm0, %v262_v18  ;;  %vm324_vm0 = vcmask 80896  }
  0xd8   : > { %270 = vst.msk [vmem:[#allocation2 + $0x30] sm:$0xf] %vm269_vm1, %v267_v5  ;;  %vm973_vm1 = vcmask 326656  }
  0xd9   : > { %v1862_v19 = vld [vmem:[#allocation2 + $0x18] sm:$0xff]  ;;  %v1864_v20 = vpop.permute.xlu0 %724  ;;  %v1866_v21 = vpop.permute.xlu1 %885 }
  0xda   : > { %841 = vrot.lane.b32.xlu1 %v1862_v19, %s1659_s28  ;;  %802 = vrot.lane.b32.xlu0 %v1862_v19, %s1651_s9 }
  0xdd   : > { %v1872_v22 = vpop.permute.xlu0 %722  ;;  %v1874_v23 = vpop.permute.xlu1 %726 }
  0xde   : > { %762 = vrot.lane.b32.xlu1 %v1862_v19, %s1660_s29  ;;  %472 = vrot.lane.b32.xlu0 %v1862_v19, %s1651_s9  ;;  %v736_v6 = vsel %vm734_vm8, %v1864_v20, %v1874_v23 }
  0xdf   : > { %v1956_v41 = vld [vmem:[#allocation2 + $0x30] sm:$0xff] }
  0xe1   : > { %v1880_v24 = vpop.permute.xlu0 %686  ;;  %v1882_v25 = vpop.permute.xlu1 %684 }
  0xe2   : > { %512 = vrot.lane.b32.xlu1 %v1862_v19, %s1661_s30  ;;  %394 = vrot.lane.b32.xlu0 %v1862_v19, %s1656_s11 }
  0xe5   : > { %v1888_v26 = vpop.permute.xlu0 %392  ;;  %v683_v27 = vpop.permute.xlu1 %682 }
  0xe6   : > { %432 = vrot.lane.b32.xlu1 %v1862_v19, %s1662_s6  ;;  %356 = vrot.lane.b32.xlu0 %v1862_v19, %s1638_s18  ;;  %v1896_v28 = vsel %vm694_vm2, %v683_v27, %v1882_v25 }
  0xe9   : > { %v1900_v30 = vpop.permute.xlu0 %314  ;;  %v1902_v31 = vpop.permute.xlu1 %354 }
  0xea   : > { %845 = vrot.lane.b32.xlu0 %v1898_v29, %s1659_s28  ;;  %316 = vrot.lane.b32.xlu1 %v1862_v19, %s1657_s24 }
  0xed   : > { %v1910_v33 = vpop.permute.xlu0 %312  ;;  %v1912_v34 = vpop.permute.xlu1 %352 }
  0xee   : > { %804 = vrot.lane.b32.xlu0 %v1908_v32, %s1651_s9  ;;  %843 = vrot.lane.b32.xlu1 %v1908_v32, %s1659_s28 }
  0xf1   : > { %v1918_v35 = vpop.permute.xlu0 %965  ;;  %v1924_v36 = vpop.permute.xlu1 %889 }
  0xf2   : > { %766 = vrot.lane.b32.xlu0 %v1898_v29, %s1660_s29  ;;  %806 = vrot.lane.b32.xlu1 %v1898_v29, %s1651_s9 }
  0xf5   : > { %v888_v37 = vpop.permute.xlu0 %887  ;;  %v2026_v44 = vpop.permute.xlu1 %925 }
  0xf6   : > { %632 = vrot.lane.b32.xlu0 %v1898_v29, %s1663_s8  ;;  %764 = vrot.lane.b32.xlu1 %v1908_v32, %s1660_s29  ;;  %v897_v38 = vsel %vm893_vm3, %v888_v37, %v1924_v36  ;;  %v896_v39 = vsel %vm893_vm3, %v1866_v21, %v888_v37 }
  0xf7   : > { %1162 = vmatprep.subr.mxu1 %v897_v38 }
  0xf8   : > { %1163 = vmatpush1.msra.mxu1 %v896_v39 }
  0xfa   : > { %552 = vrot.lane.b32.xlu0 %v1898_v29, %s1664_s17  ;;  %592 = vrot.lane.b32.xlu1 %v1898_v29, %s1642_s22 }
  0xfe   : > { %516 = vrot.lane.b32.xlu0 %v1898_v29, %s1661_s30  ;;  %514 = vrot.lane.b32.xlu1 %v1908_v32, %s1661_s30 }
 0x102   : > { %474 = vrot.lane.b32.xlu0 %v1908_v32, %s1651_s9  ;;  %476 = vrot.lane.b32.xlu1 %v1898_v29, %s1651_s9 }
 0x106   : > { %436 = vrot.lane.b32.xlu0 %v1898_v29, %s1662_s6  ;;  %434 = vrot.lane.b32.xlu1 %v1908_v32, %s1662_s6 }
 0x10a   : > { %883 = vrot.lane.b32.xlu0 %v1950_v40, %s1655_s20  ;;  %396 = vrot.lane.b32.xlu1 %v1908_v32, %s1656_s11 }
 0x10e   : > { %634 = vrot.lane.b32.xlu0 %v1956_v41, %s1663_s8  ;;  %594 = vrot.lane.b32.xlu1 %v1956_v41, %s1642_s22 }
 0x112   : > { %963 = vrot.lane.b32.xlu1 %v1950_v40, %s1658_s27  ;;  %554 = vrot.lane.b32.xlu0 %v1956_v41, %s1664_s17 }
 0x116   : > { %847 = vrot.lane.b32.xlu1 %v1956_v41, %s1659_s28  ;;  %923 = vrot.lane.b32.xlu0 %v1950_v40, %s1648_s7 }
 0x11a   : > { %636 = vrot.lane.b32.xlu1 %v1970_v42, %s1663_s8  ;;  %881 = vrot.lane.b32.xlu0 %v1970_v42, %s1655_s20 }
 0x11e   : > { %556 = vrot.lane.b32.xlu1 %v1970_v42, %s1664_s17  ;;  %596 = vrot.lane.b32.xlu0 %v1970_v42, %s1642_s22 }
 0x122   : > { %961 = vrot.lane.b32.xlu1 %v1970_v42, %s1658_s27  ;;  %921 = vrot.lane.b32.xlu0 %v1970_v42, %s1648_s7 }
 0x126   : > { %891 = vrot.lane.b32.xlu1 %v1637_v0, %s1655_s20  ;;  %849 = vrot.lane.b32.xlu0 %v1970_v42, %s1659_s28 }
 0x12a   : > { %810 = vrot.lane.b32.xlu1 %v1970_v42, %s1651_s9  ;;  %808 = vrot.lane.b32.xlu0 %v1956_v41, %s1651_s9 }
 0x12e   : > { %768 = vrot.lane.b32.xlu1 %v1956_v41, %s1660_s29  ;;  %851 = vrot.lane.b32.xlu0 %v1950_v40, %s1659_s28 }
 0x132   : > { %812 = vrot.lane.b32.xlu1 %v1950_v40, %s1651_s9  ;;  %770 = vrot.lane.b32.xlu0 %v1970_v42, %s1660_s29 }
 0x136   : > { %730 = vrot.lane.b32.xlu1 %v1908_v32, %s1654_s26  ;;  %728 = vrot.lane.b32.xlu0 %v1862_v19, %s1654_s26 }
 0x13a   : > { %688 = vrot.lane.b32.xlu1 %v1862_v19, %s1641_s21  ;;  %772 = vrot.lane.b32.xlu0 %v1950_v40, %s1660_s29 }
 0x13e   : > { %732 = vrot.lane.b32.xlu1 %v1898_v29, %s1654_s26  ;;  %690 = vrot.lane.b32.xlu0 %v1908_v32, %s1641_s21 }
 0x142   : > { %638 = vrot.lane.b32.xlu1 %v1950_v40, %s1663_s8  ;;  %692 = vrot.lane.b32.xlu0 %v1898_v29, %s1641_s21 }
 0x146   : > { %598 = vrot.lane.b32.xlu1 %v1950_v40, %s1642_s22  ;;  %640 = vrot.lane.b32.xlu0 %v1637_v0, %s1663_s8 }
 0x14a   : > { %642 = vrot.lane.b32.xlu1 %v1637_v0, %s1663_s8  ;;  %600 = vrot.lane.b32.xlu0 %v1637_v0, %s1642_s22 }
 0x14c   : > { %v2032_v45 = vpop.permute.xlu1 %841  ;;  %v2034_v46 = vpop.permute.xlu0 %802 }
 0x14e   : > { %560 = vrot.lane.b32.xlu1 %v1637_v0, %s1664_s17  ;;  %558 = vrot.lane.b32.xlu0 %v1950_v40, %s1664_s17 }
 0x150   : > { %v2040_v47 = vpop.permute.xlu1 %762  ;;  %v2042_v48 = vpop.permute.xlu0 %472 }
 0x152   : > { %602 = vrot.lane.b32.xlu0 %v1637_v0, %s1642_s22  ;;  %518 = vrot.lane.b32.xlu1 %v1956_v41, %s1661_s30  ;;  %s1420_s22 = smul.u32 40, %s1806_s10 }
 0x154   : > { %v2048_v49 = vpop.permute.xlu1 %512  ;;  %v2050_v50 = vpop.permute.xlu0 %394 }
 0x156   : > { %520 = vrot.lane.b32.xlu0 %v1970_v42, %s1661_s30  ;;  %562 = vrot.lane.b32.xlu1 %v1637_v0, %s1664_s17 }
 0x158   : > { %v2056_v51 = vpop.permute.xlu1 %432  ;;  %v2058_v52 = vpop.permute.xlu0 %356 }
 0x15a   : > { %480 = vrot.lane.b32.xlu1 %v1970_v42, %s1651_s9  ;;  %478 = vrot.lane.b32.xlu0 %v1956_v41, %s1651_s9 }
 0x15c   : > { %v2064_v53 = vpop.permute.xlu1 %316  ;;  %v2066_v54 = vpop.permute.xlu0 %845 }
 0x15e   : > { %522 = vrot.lane.b32.xlu0 %v1950_v40, %s1661_s30  ;;  %438 = vrot.lane.b32.xlu1 %v1956_v41, %s1662_s6 }
 0x160   : > { %v844_v55 = vpop.permute.xlu1 %843  ;;  %v805_v56 = vpop.permute.xlu0 %804 }
 0x161   : > { %v855_v27 = vsel %vm853_vm5, %v844_v55, %v2066_v54 }
 0x162   : > { %440 = vrot.lane.b32.xlu0 %v1970_v42, %s1662_s6  ;;  %482 = vrot.lane.b32.xlu1 %v1950_v40, %s1651_s9  ;;  %s1421_s9 = smul.u32 640, %s1708_s16  ;;  %s1666_s16 = smov [#allocation9]  }
 0x163   : > { %s1569_s28 = sshll.u32 %s1666_s16, 4  ;;  %s1570_s28 = int_to_ptr.vmem [resolvable:$false] %s1569_s28 }
 0x164   : > { %v2076_v57 = vpop.permute.xlu1 %806  ;;  %v2078_v58 = vpop.permute.xlu0 %766  ;;  %s1571_s29 = scalar_lea.vmem %s1570_s28, 1280 }
 0x165   : > { %v815_v39 = vsel %vm484_vm6, %v805_v56, %v2076_v57 }
 0x166   : > { %398 = vrot.lane.b32.xlu0 %v1898_v29, %s1656_s11  ;;  %400 = vrot.lane.b32.xlu1 %v1956_v41, %s1656_s11 }
 0x168   : > { %v765_v59 = vpop.permute.xlu1 %764  ;;  %v2084_v60 = vpop.permute.xlu0 %632 }
 0x16a   : > { %442 = vrot.lane.b32.xlu0 %v1950_v40, %s1662_s6  ;;  %358 = vrot.lane.b32.xlu1 %v1908_v32, %s1638_s18  ;;  %v814_v40 = vsel %vm484_vm6, %v2034_v46, %v805_v56  ;;  %v735_v46 = vsel %vm734_vm8, %v1872_v22, %v1864_v20  ;;  %v696_v56 = vsel %vm694_vm2, %v1882_v25, %v1880_v24 }
 0x16c   : > { %v2090_v61 = vpop.permute.xlu1 %592  ;;  %v2092_v62 = vpop.permute.xlu0 %552 }
 0x16e   : > { %360 = vrot.lane.b32.xlu0 %v1898_v29, %s1638_s18  ;;  %402 = vrot.lane.b32.xlu1 %v1970_v42, %s1656_s11  ;;  %v775_v42 = vsel %vm774_vm7, %v2040_v47, %v765_v59  ;;  %s2354_s11 = scalar_lea.hbm %s2394_s3, %s1421_s9 }
 0x170   : > { %v2098_v63 = vpop.permute.xlu1 %514  ;;  %v2100_v1 = vpop.permute.xlu0 %516 }
 0x172   : > { %318 = vrot.lane.b32.xlu0 %v1908_v32, %s1657_s24  ;;  %320 = vrot.lane.b32.xlu1 %v1898_v29, %s1657_s24  ;;  %v854_v29 = vsel %vm853_vm5, %v2032_v45, %v844_v55 }
 0x174   : > { %v2106_v2 = vpop.permute.xlu1 %476  ;;  %v2108_v3 = vpop.permute.xlu0 %474 }
 0x176   : > { %967 = vrot.lane.b32.xlu1 %v1637_v0, %s1658_s27  ;;  %362 = vrot.lane.b32.xlu0 %v1956_v41, %s1638_s18 }
 0x178   : > { %v2114_v4 = vpop.permute.xlu1 %434  ;;  %v2116_v5 = vpop.permute.xlu0 %436 }
 0x17a   : > { %969 = vrot.lane.b32.xlu0 %v1637_v0, %s1658_s27  ;;  %322 = vrot.lane.b32.xlu1 %v1956_v41, %s1657_s24  ;;  %v776_v41 = vsel %vm774_vm7, %v765_v59, %v2078_v58  ;;  %s1309_s24 = scalar_lea.sflag [#allocation6], %s1806_s10 }
 0x17c   : > { %v2122_v7 = vpop.permute.xlu1 %396  ;;  %v884_v8 = vpop.permute.xlu0 %883 }
 0x17d   : > { %v895_v9 = vsel %vm893_vm3, %v884_v8, %v1866_v21 }
 0x17e   : > { %929 = vrot.lane.b32.xlu1 %v1637_v0, %s1648_s7  ;;  %927 = vrot.lane.b32.xlu0 %v1637_v0, %s1648_s7 }
 0x17f   : > { %1091 = vmatprep.subr.mxu0 %v895_v9 }
 0x180   : > { %v595_v10 = vpop.permute.xlu1 %594  ;;  %v635_v11 = vpop.permute.xlu0 %634 }
 0x181   : > { %v645_v25 = vsel %vm644_vm9, %v2084_v60, %v635_v11 }
 0x182   : > { %931 = vrot.lane.b32.xlu1 %v1637_v0, %s1648_s7  ;;  %971 = vrot.lane.b32.xlu0 %v1637_v0, %s1658_s27  ;;  %s199_s7 = scalar_lea.vmem [#allocation9], %s1420_s22 }
 0x183   : > { %s1323_s25 = sshll.u32 %s199_s7, 4  ;;  %s1324_s25 = int_to_ptr.vmem [resolvable:$true] %s1323_s25 }
 0x184   : > { %v2137_v13 = vpop.permute.xlu1 %963  ;;  %v2139_v14 = vpop.permute.xlu0 %554  ;;  %s1565_s27 = scalar_lea.vmem %s1324_s25, 640  ;;  %p1572_p1 = scmp.lt.s32.totalorder %s1324_s25, %s1570_s28 }
 0x185   : > { %p1566_p9 = scmp.ne.s32.totalorder %s1324_s25, %s1565_s27  ;;  %p1573_p2 = scmp.lt.s32.totalorder %s1571_s29, %s1565_s27 }
 0x186   : > { %1084 = vperm.xlu0 %1508, %v1081_v12  }
 0x187   : > { %p1567_p13 = pnand %p1566_p9, %p2415_p11  ;;  %p1574_p0 = por %p1573_p2, %p1572_p1 }
 0x188   : > { %v848_v15 = vpop.permute.xlu1 %847  ;;  %v2141_v16 = vpop.permute.xlu0 %923 }
 0x189   : > { %v856_v22 = vsel %vm853_vm5, %v2066_v54, %v848_v15  ;;  %p1568_p10 = pneg %p1567_p13 }
 0x18b   : > { %p1575_p3 = pnand %p1574_p0, %p1568_p10 }
 0x18c   : > { %v2143_v17 = vpop.permute.xlu1 %636  ;;  %v882_v18 = vpop.permute.xlu0 %881 }
 0x18d   : > { %v894_v21 = vsel %vm893_vm3, %v882_v18, %v884_v8  ;;  %v646_v20 = vsel %vm644_vm9, %v635_v11, %v2143_v17  ;;  %v605_v18 = vsel %vm604_vm10, %v2090_v61, %v595_v10  ;;  %v565_v11 = vsel %vm564_vm11, %v2092_v62, %v2139_v14 }
 0x18e   : > { %1092 = vmatpush1.msra.mxu0 %v894_v21  ;;  %v525_v21 = vsel %vm524_vm12, %v2048_v49, %v2098_v63  ;;  %v485_v62 = vsel %vm484_vm6, %v2042_v48, %v2108_v3  ;;  %v445_v49 = vsel %vm444_vm13, %v2056_v51, %v2114_v4  ;;  %v406_v48 = vsel %vm2399_vm14, %v2050_v50, %v2122_v7 }
 0x18f   : > { %1093 = vmatprep.subr.mxu0 %v855_v27  ;;  %v486_v27 = vsel %vm484_vm6, %v2108_v3, %v2106_v2 }
 0x190   : > { %v2150_v37 = vpop.permute.xlu1 %556  ;;  %1094 = vmatpush1.msra.mxu0 %v854_v29  ;;  %v2152_v38 = vpop.permute.xlu0 %596 }
 0x191   : > { %1095 = vmatprep.subr.mxu0 %v815_v39  ;;  %v606_v12 = vsel %vm604_vm10, %v595_v10, %v2152_v38  ;;  %v566_v60 = vsel %vm564_vm11, %v2139_v14, %v2150_v37  ;;  %v446_v39 = vsel %vm444_vm13, %v2114_v4, %v2116_v5 }
 0x192   : > { %1096 = vmatpush1.msra.mxu0 %v814_v40  ;;  %v405_v40 = vsel %vm2399_vm14, %v1888_v26, %v2050_v50  ;;  %v326_v26 = vsel %vm324_vm0, %v1900_v30, %v2064_v53  ;;  %v325_v50 = vsel %vm324_vm0, %v1910_v33, %v1900_v30  ;;  %vm933_vm14 = vcmask 424960  }
 0x193   : > { %1097 = vmatprep.subr.mxu0 %v776_v41  ;;  %v366_v41 = vsel %vm364_vm15, %v1902_v31, %v2058_v52 }
 0x194   : > { %v2162_v45 = vpop.permute.xlu1 %961  ;;  %1098 = vmatpush1.msra.mxu0 %v775_v42  ;;  %v2164_v55 = vpop.permute.xlu0 %921 }
 0x195   : > { %1099 = vmatprep.subr.mxu0 %v736_v6  ;;  %v934_v30 = vsel %vm933_vm14, %v2164_v55, %v2141_v16 }
 0x196   : > { %1100 = vmatpush1.msra.mxu0 %v735_v46  ;;  %v974_v46 = vsel %vm973_vm1, %v2162_v45, %v2137_v13 }
 0x197   : > { %1101 = vmatprep.subr.mxu0 %v696_v56  ;;  %v935_v56 = vsel %vm933_vm14, %v2141_v16, %v2026_v44 }
 0x198   : > { %v2175_v47 = vpop.permute.xlu1 %891  ;;  %1102 = vmatpush1.msra.mxu0 %v1896_v28  ;;  %v2178_v59 = vpop.permute.xlu0 %849 }
 0x199   : > { %1103 = vmatprep.subr.mxu0 %v1637_v0  ;;  %v857_v8 = vsel %vm853_vm5, %v848_v15, %v2178_v59 }
 0x19a   : > { %1104 = vmatpush1.msra.mxu0 %v1637_v0  ;;  %1164 = vmatprep.subr.mxu1 %v857_v8  ;;  %v2262_v8 = vld [vmem:[#allocation7] sm:$0xff] }
 0x19b   : > { %1105 = vmatprep.subr.mxu0 %v646_v20  ;;  %1165 = vmatpush1.msra.mxu1 %v856_v22  ;;  %v898_v22 = vsel %vm893_vm3, %v1924_v36, %v2175_v47 }
 0x19c   : > { %v2190_v28 = vpop.permute.xlu1 %810  ;;  %1106 = vmatpush1.msra.mxu0 %v645_v25  ;;  %v809_v9 = vpop.permute.xlu0 %808 }
 0x19d   : > { %1107 = vmatprep.subr.mxu0 %v606_v12  ;;  %v817_v54 = vsel %vm484_vm6, %v809_v9, %v2190_v28  ;;  %v816_v15 = vsel %vm484_vm6, %v2076_v57, %v809_v9  ;;  %v526_v57 = vsel %vm524_vm12, %v2098_v63, %v2100_v1 }
 0x19e   : > { %1108 = vmatpush1.msra.mxu0 %v605_v18  ;;  %1166 = vmatprep.subr.mxu1 %v817_v54 }
 0x19f   : > { %1109 = vmatprep.subr.mxu0 %v566_v60  ;;  %1167 = vmatpush1.msra.mxu1 %v816_v15 }
 0x1a0   : > { %v769_v61 = vpop.permute.xlu1 %768  ;;  %1110 = vmatpush1.msra.mxu0 %v565_v11  ;;  %v2206_v10 = vpop.permute.xlu0 %851 }
 0x1a1   : > { %1111 = vmatprep.subr.mxu0 %v526_v57  ;;  %v777_v3 = vsel %vm774_vm7, %v2078_v58, %v769_v61  ;;  %v365_v58 = vsel %vm364_vm15, %v1912_v34, %v1902_v31  ;;  %v858_v16 = vsel %vm853_vm5, %v2178_v59, %v2206_v10 }
 0x1a2   : > { %1112 = vmatpush1.msra.mxu0 %v525_v21 }
 0x1a3   : > { %1113 = vmatprep.subr.mxu0 %v486_v27 }
 0x1a4   : > { %v813_v14 = vpop.permute.xlu1 %812  ;;  %1114 = vmatpush1.msra.mxu0 %v485_v62  ;;  %v2220_v29 = vpop.permute.xlu0 %770 }
 0x1a5   : > { %1115 = vmatprep.subr.mxu0 %v446_v39  ;;  %v778_v63 = vsel %vm774_vm7, %v769_v61, %v2220_v29  ;;  %v818_v47 = vsel %vm484_vm6, %v2190_v28, %v813_v14 }
 0x1a6   : > { %1116 = vmatpush1.msra.mxu0 %v445_v49  ;;  %1168 = vmatprep.subr.mxu1 %v778_v63 }
 0x1a7   : > { %1117 = vmatprep.subr.mxu0 %v406_v48  ;;  %1169 = vmatpush1.msra.mxu1 %v777_v3 }
 0x1a8   : > { %v731_v51 = vpop.permute.xlu1 %730  ;;  %1118 = vmatpush1.msra.mxu0 %v405_v40  ;;  %v729_v4 = vpop.permute.xlu0 %728 }
 0x1a9   : > { %1119 = vmatprep.subr.mxu0 %v366_v41  ;;  %v738_v42 = vsel %vm734_vm8, %v729_v4, %v731_v51  ;;  %v737_v6 = vsel %vm734_vm8, %v1874_v23, %v729_v4  ;;  %v975_v23 = vsel %vm973_vm1, %v2137_v13, %v1918_v35 }
 0x1aa   : > { %1120 = vmatpush1.msra.mxu0 %v365_v58  ;;  %1170 = vmatprep.subr.mxu1 %v738_v42 }
 0x1ab   : > { %1121 = vmatprep.subr.mxu0 %v326_v26  ;;  %1171 = vmatpush1.msra.mxu1 %v737_v6 }
 0x1ac   : > { %v689_v31 = vpop.permute.xlu1 %688  ;;  %1122 = vmatpush1.msra.mxu0 %v325_v50  ;;  %v773_v34 = vpop.permute.xlu0 %772 }
 0x1ad   : > { %1151 = vmatprep.subr.mxu0 %v975_v23  ;;  %v697_v45 = vsel %vm694_vm2, %v1880_v24, %v689_v31  ;;  %v779_v24 = vsel %vm774_vm7, %v2220_v29, %v773_v34 }
 0x1ae   : > { %1152 = vmatpush2.msra.mxu0 %v974_v46 }
 0x1af   : > { %1153 = vmatprep.subr.mxu0 %v935_v56 }
 0x1b0   : > { %v733_v33 = vpop.permute.xlu1 %732  ;;  %1154 = vmatpush2.msra.mxu0 %v934_v30  ;;  %v691_v20 = vpop.permute.xlu0 %690 }
 0x1b1   : > { %1233 = vmatprep.subr.mxu0 %v1637_v0  ;;  %1156 = vmatmul.mubr.f32.vlgmr.msra.gmra.mxu0 %v2262_v8  ;;  %v698_v13 = vsel %vm694_vm2, %v689_v31, %v691_v20  ;;  %v739_v25 = vsel %vm734_vm8, %v731_v51, %v733_v33 }
 0x1b2   : > { %1172 = vmatprep.subr.mxu1 %v698_v13  ;;  %1234 = vmatpush1.msra.mxu0 %v898_v22 }
 0x1b3   : > { %1173 = vmatpush1.msra.mxu1 %v697_v45  ;;  %1235 = vmatprep.subr.mxu0 %v1637_v0 }
 0x1b4   : > { %v639_v55 = vpop.permute.xlu1 %638  ;;  %1174 = vmatprep.subr.mxu1 %v1862_v19  ;;  %1236 = vmatpush1.msra.mxu0 %v858_v16  ;;  %v693_v36 = vpop.permute.xlu0 %692 }
 0x1b5   : > { %1237 = vmatprep.subr.mxu0 %v1637_v0  ;;  %1175 = vmatpush1.msra.mxu1 %v1637_v0  ;;  %v647_v9 = vsel %vm644_vm9, %v2143_v17, %v639_v55 }
 0x1b6   : > { %1238 = vmatpush1.msra.mxu0 %v818_v47  ;;  %1415 = vmatprep.mubr.msk.f32.mxu0 %vm1087_vm4, %v1996_v43  ;;  %v699_v43 = vsel %vm694_vm2, %v691_v20, %v693_v36  ;;  %vm2412_vm2 = vcmask 1031168  }
 0x1b7   : > { %1239 = vmatprep.subr.mxu0 %v1637_v0  ;;  %vm2413_vm3 = vmmov %vm2412_vm2 }
 0x1b8   : > { %v599_v59 = vpop.permute.xlu1 %598  ;;  %1240 = vmatpush1.msra.mxu0 %v779_v24  ;;  %v641_v19 = vpop.permute.xlu0 %640  ;;  %vm2414_vm4 = vmmov %vm2412_vm2 }
 0x1b9   : > { %1241 = vmatprep.subr.mxu0 %v1637_v0  ;;  %v648_v28 = vsel %vm644_vm9, %v639_v55, %v641_v19  ;;  %v607_v15 = vsel %vm604_vm10, %v2152_v38, %v599_v59  ;;  %v1510_v55 = vld [vmem:[#allocation2 + $0x8] sm:$0xff] }
 0x1ba   : > { %1176 = vmatprep.subr.mxu1 %v648_v28  ;;  %1242 = vmatpush1.msra.mxu0 %v739_v25 }
 0x1bb   : > { %1177 = vmatpush1.msra.mxu1 %v647_v9  ;;  %1243 = vmatprep.subr.mxu0 %v1637_v0 }
 0x1bc   : > { %v643_v12 = vpop.permute.xlu1 %642  ;;  %1244 = vmatpush1.msra.mxu0 %v699_v43  ;;  %v601_v18 = vpop.permute.xlu0 %600 }
 0x1bd   : > { %1245 = vmatprep.subr.mxu0 %v1637_v0  ;;  %v608_v54 = vsel %vm604_vm10, %v599_v59, %v601_v18  ;;  %v649_v17 = vsel %vm644_vm9, %v641_v19, %v643_v12 }
 0x1be   : > { %1178 = vmatprep.subr.mxu1 %v608_v54  ;;  %1246 = vmatpush1.msra.mxu0 %v1908_v32 }
 0x1bf   : > { %1179 = vmatpush1.msra.mxu1 %v607_v15  ;;  %1247 = vmatprep.subr.mxu0 %v1637_v0 }
 0x1c0   : > { %v561_v60 = vpop.permute.xlu1 %560  ;;  %1248 = vmatpush1.msra.mxu0 %v649_v17  ;;  %v559_v11 = vpop.permute.xlu0 %558 }
 0x1c1   : > { %v568_v61 = vsel %vm564_vm11, %v559_v11, %v561_v60  ;;  %v567_v10 = vsel %vm564_vm11, %v2150_v37, %v559_v11  ;;  %1249 = vmatprep.subr.mxu0 %v1637_v0 }
 0x1c2   : > { %1180 = vmatprep.subr.mxu1 %v568_v61 }
 0x1c3   : > { %1181 = vmatpush1.msra.mxu1 %v567_v10 }
 0x1c4   : > { %v519_v32 = vpop.permute.xlu1 %518  ;;  %v603_v57 = vpop.permute.xlu0 %602 }
 0x1c5   : > { %v609_v38 = vsel %vm604_vm10, %v601_v18, %v603_v57  ;;  %v527_v37 = vsel %vm524_vm12, %v2100_v1, %v519_v32 }
 0x1c6   : > { %1250 = vmatpush1.msra.mxu0 %v609_v38 }
 0x1c7   : > { %1251 = vmatprep.subr.mxu0 %v1637_v0 }
 0x1c8   : > { %v563_v21 = vpop.permute.xlu1 %562  ;;  %v521_v27 = vpop.permute.xlu0 %520 }
 0x1c9   : > { %v569_v62 = vsel %vm564_vm11, %v561_v60, %v563_v21  ;;  %v528_v14 = vsel %vm524_vm12, %v519_v32, %v521_v27 }
 0x1ca   : > { %1182 = vmatprep.subr.mxu1 %v528_v14  ;;  %1252 = vmatpush1.msra.mxu0 %v569_v62 }
 0x1cb   : > { %1183 = vmatpush1.msra.mxu1 %v527_v37  ;;  %1253 = vmatprep.subr.mxu0 %v1637_v0 }
 0x1cc   : > { %v481_v29 = vpop.permute.xlu1 %480  ;;  %v479_v39 = vpop.permute.xlu0 %478 }
 0x1cd   : > { %v488_v49 = vsel %vm484_vm6, %v479_v39, %v481_v29  ;;  %v487_v63 = vsel %vm484_vm6, %v2106_v2, %v479_v39 }
 0x1ce   : > { %1184 = vmatprep.subr.mxu1 %v488_v49 }
 0x1cf   : > { %1185 = vmatpush1.msra.mxu1 %v487_v63 }
 0x1d0   : > { %v439_v48 = vpop.permute.xlu1 %438  ;;  %v523_v3 = vpop.permute.xlu0 %522 }
 0x1d1   : > { %v529_v40 = vsel %vm524_vm12, %v521_v27, %v523_v3  ;;  %v447_v2 = vsel %vm444_vm13, %v2116_v5, %v439_v48 }
 0x1d2   : > { %1254 = vmatpush1.msra.mxu0 %v529_v40 }
 0x1d3   : > { %1255 = vmatprep.subr.mxu0 %v1637_v0 }
 0x1d4   : > { %v483_v1 = vpop.permute.xlu1 %482  ;;  %v441_v51 = vpop.permute.xlu0 %440 }
 0x1d5   : > { %v489_v4 = vsel %vm484_vm6, %v481_v29, %v483_v1  ;;  %v448_v41 = vsel %vm444_vm13, %v439_v48, %v441_v51 }
 0x1d6   : > { %1186 = vmatprep.subr.mxu1 %v448_v41  ;;  %1256 = vmatpush1.msra.mxu0 %v489_v4 }
 0x1d7   : > { %1187 = vmatpush1.msra.mxu1 %v447_v2  ;;  %1257 = vmatprep.subr.mxu0 %v1637_v0 }
 0x1d8   : > { %v401_v58 = vpop.permute.xlu1 %400  ;;  %v399_v42 = vpop.permute.xlu0 %398 }
 0x1d9   : > { %v408_v6 = vsel %vm2412_vm2, %v399_v42, %v401_v58  ;;  %v407_v26 = vsel %vm2413_vm3, %v2122_v7, %v399_v42 }
 0x1da   : > { %1188 = vmatprep.subr.mxu1 %v408_v6 }
 0x1db   : > { %1189 = vmatpush1.msra.mxu1 %v407_v26 }
 0x1dc   : > { %v359_v50 = vpop.permute.xlu1 %358  ;;  %v443_v31 = vpop.permute.xlu0 %442 }
 0x1dd   : > { %v449_v34 = vsel %vm444_vm13, %v441_v51, %v443_v31  ;;  %v367_v7 = vsel %vm364_vm15, %v2058_v52, %v359_v50 }
 0x1de   : > { %1258 = vmatpush1.msra.mxu0 %v449_v34 }
 0x1df   : > { %1259 = vmatprep.subr.mxu0 %v1637_v0 }
 0x1e0   : > { %v403_v5 = vpop.permute.xlu1 %402  ;;  %v361_v23 = vpop.permute.xlu0 %360 }
 0x1e1   : > { %v409_v46 = vsel %vm2414_vm4, %v401_v58, %v403_v5  ;;  %v368_v56 = vsel %vm364_vm15, %v359_v50, %v361_v23 }
 0x1e2   : > { %1190 = vmatprep.subr.mxu1 %v368_v56  ;;  %1260 = vmatpush1.msra.mxu0 %v409_v46 }
 0x1e3   : > { %1191 = vmatpush1.msra.mxu1 %v367_v7  ;;  %1261 = vmatprep.subr.mxu0 %v1637_v0 }
 0x1e4   : > { %v321_v30 = vpop.permute.xlu1 %320  ;;  %v319_v33 = vpop.permute.xlu0 %318 }
 0x1e5   : > { %v328_v20 = vsel %vm324_vm0, %v319_v33, %v321_v30  ;;  %v327_v22 = vsel %vm324_vm0, %v2064_v53, %v319_v33 }
 0x1e6   : > { %1192 = vmatprep.subr.mxu1 %v328_v20 }
 0x1e7   : > { %1193 = vmatpush1.msra.mxu1 %v327_v22 }
 0x1e8   : > { %v968_v13 = vpop.permute.xlu1 %967  ;;  %v363_v45 = vpop.permute.xlu0 %362 }
 0x1e9   : > { %v369_v16 = vsel %vm364_vm15, %v361_v23, %v363_v45  ;;  %v976_v53 = vsel %vm973_vm1, %v1918_v35, %v968_v13 }
 0x1ea   : > { %1262 = vmatpush1.msra.mxu0 %v369_v16 }
 0x1eb   : > { %1263 = vmatprep.subr.mxu0 %v1510_v55 }
 0x1ec   : > { %v323_v52 = vpop.permute.xlu1 %322  ;;  %v970_v36 = vpop.permute.xlu0 %969 }
 0x1ed   : > { %v329_v0 = vsel %vm324_vm0, %v321_v30, %v323_v52  ;;  %v977_v47 = vsel %vm973_vm1, %v968_v13, %v970_v36 }
 0x1ee   : > { %1222 = vmatprep.subr.mxu1 %v977_v47  ;;  %1264 = vmatpush1.msra.mxu0 %v329_v0 }
 0x1ef   : > { %1223 = vmatpush2.msra.mxu1 %v976_v53  ;;  %1293 = vmatprep.subr.mxu0 %v1510_v55 }
 0x1f0   : > { %v930_v24 = vpop.permute.xlu1 %929  ;;  %v928_v59 = vpop.permute.xlu0 %927 }
 0x1f1   : > { %v937_v19 = vsel %vm933_vm14, %v928_v59, %v930_v24  ;;  %v936_v25 = vsel %vm933_vm14, %v2026_v44, %v928_v59 }
 0x1f2   : > { %1224 = vmatprep.subr.mxu1 %v937_v19 }
 0x1f3   : > { %1225 = vmatpush2.msra.mxu1 %v936_v25 }
 0x1f4   : > { %v932_v28 = vpop.permute.xlu1 %931  ;;  %v972_v9 = vpop.permute.xlu0 %971  ;;  %1227 = vmatmul.mubr.f32.vlgmr.msra.gmra.mxu1 %v2262_v8 }
 0x1f5   : > { %v978_v43 = vsel %vm973_vm1, %v970_v36, %v972_v9  ;;  %v938_v35 = vsel %vm933_vm14, %v930_v24, %v932_v28 }
 0x1f6   : > { %1294 = vmatpush2.msra.mxu0 %v978_v43 }
 0x1f7   : > { %1295 = vmatprep.subr.mxu0 %v1510_v55 }
 0x1f8   : > { %1296 = vmatpush2.msra.mxu0 %v938_v35 }
 0x1f9   : > { %1298 = vmatmul.mubr.f32.vlgmr.msra.gmra.mxu0 %v2262_v8 }
 0x201   : > { %v1085_v12 = vpop.permute.xlu0 %1084 }
 0x271   : > { %v1157_v18 = vpop.f32.mrf.mxu0 }
 0x272   : > { %v1158_v44 = vadd.f32 %v1157_v18, %v1085_v12 }
 0x273   : > { %v1159_v54 = vpop.f32.mrf.mxu0 }
 0x274   : > { %v1160_v15 = vadd.f32 %v1159_v54, %v1085_v12  ;;  %1303 = vst [vmem:[%s199_s7] sm:$0xff] %v1158_v44 }
 0x276   : > { %1304 = vst [vmem:[%s199_s7 + $0x8] sm:$0xff] %v1160_v15 }
 0x2b4   : > { %v1228_v17 = vpop.f32.mrf.mxu1 }
 0x2b5   : > { %v1229_v60 = vadd.f32 %v1228_v17, %v1085_v12 }
 0x2b6   : > { %v1230_v11 = vpop.f32.mrf.mxu1 }
 0x2b7   : > { %1305 = vst [vmem:[%s199_s7 + $0x10] sm:$0xff] %v1229_v60  ;;  %v1231_v61 = vadd.f32 %v1230_v11, %v1085_v12 }
 0x2b9   : > { %1306 = vst [vmem:[%s199_s7 + $0x18] sm:$0xff] %v1231_v61  ;;  %v1299_v8 = vpop.f32.mrf.mxu0 }
 0x2ba   : > { %v1300_v10 = vadd.f32 %v1299_v8, %v1085_v12 }
 0x2bb   : > { %v1301_v32 = vpop.f32.mrf.mxu0 }
 0x2bc   : > { %1307 = vst [vmem:[%s199_s7 + $0x20] sm:$0xff] %v1300_v10 }
 0x2bd   : > { %1578 = shalt.err (!%p1575_p3)
}
 0x2be   : > { %s1579_s30 = scalar_lea.hbm %s2354_s11, 640  ;;  %s1583_s8 = scalar_lea.hbm %s2394_s3, 1280 }
 0x2bf   : > { %p1580_p12 = scmp.ne.s32.totalorder %s2354_s11, %s1579_s30  ;;  %p1584_p6 = scmp.lt.s32.totalorder %s2354_s11, %s2394_s3 }
 0x2c0   : > { %p1585_p4 = scmp.lt.s32.totalorder %s1583_s8, %s1579_s30 }
 0x2c1   : > { %p1581_p5 = pnand %p1580_p12, %p2415_p11 }
 0x2c2   : > { %p1586_p8 = por %p1585_p4, %p1584_p6 }
 0x2c3   : > { %p1582_p7 = pneg %p1581_p5 }
 0x2c5   : > { %p1587_p9 = pnand %p1586_p8, %p1582_p7 }
 0x2c7   : > { %1590 = shalt.err (!%p1587_p9)
}
 0x2c8   : > { %1428 = dma.vmem_to_hbm [thread:$0]  (%p2415_p11), %s1324_s25, 640, %s2354_s11, %s1309_s24  }
 0x2c9 PF: > { %s1335_s21 = sand.u32 1, %s1621_s12   ;;  %p2416_p13 = scmp.ne.s32.totalorder %s2401_s19, 0 }
 0x2ca   : > { %p2417_p10 = scmp.ge.s32.totalorder %s1633_s15, 2  ;;  %s1336_s22 = scalar_lea.sflag [#allocation6], %s1335_s21 }
 0x2cc   : > { %p1439_p1 = pnand %p2417_p10, %p2416_p13 }
 0x2ce   : > { %p1440_p2 = pneg %p1439_p1 }
 0x2d0   : > { %1616 = dma.done.wait (%p1440_p2), %s1336_s22, 640  }
 0x2d1   : > { %1618 = vsyncadd (%p1440_p2), %s1336_s22, 4294966656  ;;  %p17_p0 = scmp.ge.s32.totalorder %s1735_s23, 4   ;;  %s2418_s12 = smov %s1625_s13 }
 0x2d2   : > { %s2419_s13 = smov %s1629_s14  ;;  %s2420_s14 = smov %s1762_s4 }
 0x2d3   : > { %s2421_s15 = smov %s1735_s23  ;;  %19 = sbr.rel (!%p17_p0) target bundleno = 6 (0x6), region = 81 }
 0x2d8   :  { %1341 = vsyncpa [#allocation5], 1 }
 0x2d9   :  { %1343 = vsyncpa [#allocation5 + $0x1], 1 }
 0x2da   :  { %1344 = vsyncpa [#allocation8], 1 }
 0x2db   :  { %1345 = vsyncpa [#allocation6], 1 }
 0x2dc   :  { %1347 = vsyncpa [#allocation6 + $0x1], 1 }

</bundles_post_ra>
